<compile_context>
chip_gen: v5e
topology: v5e:2x2
jax: 0.10.0
libtpu: 0.0.40
codegen_flags: <defaults>
</compile_context>

<pallas_src>
import functools
import math

import jax
import jax.numpy as jnp
from jax.experimental import pallas as pl
from jax.experimental.pallas import tpu as pltpu

_LANE = 128
_SUBLANE = 8


def _round_up(n, m):
    return ((n + m - 1) // m) * m


def _pad_axis(a, axis, target):
    pad = target - a.shape[axis]
    if pad == 0:
        return a
    widths = [(0, 0)] * a.ndim
    widths[axis] = (0, pad)
    return jnp.pad(a, widths)


def _eve_kernel(*refs, depth, compute_dtype):
    if depth > 1:
        (x_ref, w_in_ref, b_in_ref, w_mlp_ref, b_mlp_ref,
         w_out_ref, b_out_ref, o_ref) = refs
    else:
        x_ref, w_in_ref, b_in_ref, w_out_ref, b_out_ref, o_ref = refs
        w_mlp_ref = b_mlp_ref = None

    # input linear + ReLU: operands in compute_dtype, f32 MXU accumulation
    x = x_ref[...].astype(compute_dtype)
    h = jnp.dot(x, w_in_ref[...], preferred_element_type=jnp.float32)
    h = jnp.maximum(h + b_in_ref[...], 0.0)

    # (depth-1) residual layers: relu(h + (h @ W + b)); h stays f32 on the VPU
    for d in range(depth - 1):
        y = jnp.dot(h.astype(compute_dtype), w_mlp_ref[d],
                    preferred_element_type=jnp.float32)
        h = jnp.maximum(h + y + b_mlp_ref[d], 0.0)

    # output linear + tanh (EUP); padded output lanes are exactly 0 -> tanh 0
    out = jnp.dot(h.astype(compute_dtype), w_out_ref[...],
                  preferred_element_type=jnp.float32)
    o_ref[...] = jnp.tanh(out + b_out_ref[...]).astype(o_ref.dtype)


def prepare_params(params, *, depth, use_bf16=True):
    """One-time per-model padding/casting so eve_forward has zero per-call
    weight HLOs.  Only the output feature dim is lane-padded (for the
    unmasked vst); biases stay f32."""
    w_in, b_in, w_mlp, b_mlp, w_out, b_out = params
    compute_dtype = jnp.bfloat16 if use_bf16 else jnp.float32
    plain_p = _round_up(w_out.shape[1], _LANE)

    prepared = dict(
        w_in=w_in.astype(compute_dtype),
        b_in=b_in,                                          # f32 bias
        w_out=_pad_axis(w_out, 1, plain_p).astype(compute_dtype),
        b_out=_pad_axis(b_out, 1, plain_p),                 # f32 bias
    )
    if depth > 1:
        prepared["w_mlp"] = w_mlp.astype(compute_dtype)
        prepared["b_mlp"] = b_mlp                           # f32 bias
    return prepared


def eve_forward(x, prepared, *, depth, plain, block_m=None):
    """x: [B, cipher] float32, prepared: output of prepare_params.
    Returns [B, plain] float32."""
    w_in, b_in = prepared["w_in"], prepared["b_in"]
    w_out, b_out = prepared["w_out"], prepared["b_out"]
    B, cipher = x.shape
    hidden = w_in.shape[1]
    plain_p = w_out.shape[1]
    compute_dtype = w_in.dtype
    n_mlp = depth - 1

    # grid=(1,) by default: no per-step overhead on single-TC v5e/v6e and the
    # whole working set trivially fits VMEM.  Pass block_m to tile the batch
    # (large B, or a *measured* 2-TC win on v7x).
    if block_m is None or block_m >= B:
        bm, Bp, x_in = B, B, x
    else:
        bm = min(_round_up(block_m, _SUBLANE), B)
        Bp = _round_up(B, bm)
        x_in = _pad_axis(x, 0, Bp)
    grid = (Bp // bm,)

    operands = [x_in, w_in, b_in]
    in_specs = [
        pl.BlockSpec((bm, cipher), lambda i: (i, 0)),        # x, natural width
        pl.BlockSpec((cipher, hidden), lambda i: (0, 0)),    # W_in (VMEM-resident)
        pl.BlockSpec((1, hidden), lambda i: (0, 0)),         # b_in
    ]
    if n_mlp > 0:
        operands += [prepared["w_mlp"], prepared["b_mlp"]]
        in_specs += [
            pl.BlockSpec((n_mlp, hidden, hidden), lambda i: (0, 0, 0)),  # W_mlp
            pl.BlockSpec((n_mlp, 1, hidden), lambda i: (0, 0, 0)),       # b_mlp
        ]
    operands += [w_out, b_out]
    in_specs += [
        pl.BlockSpec((hidden, plain_p), lambda i: (0, 0)),   # W_out
        pl.BlockSpec((1, plain_p), lambda i: (0, 0)),        # b_out
    ]

    flops = 2 * Bp * (cipher * hidden + n_mlp * hidden * hidden
                      + hidden * plain_p)
    bytes_accessed = int(sum(a.size * a.dtype.itemsize for a in operands)
                         + Bp * plain_p * 4)

    kernel = functools.partial(_eve_kernel, depth=depth,
                               compute_dtype=compute_dtype)

    out_p = pl.pallas_call(
        kernel,
        out_shape=jax.ShapeDtypeStruct((Bp, plain_p), jnp.float32),
        grid_spec=pltpu.PrefetchScalarGridSpec(
            num_scalar_prefetch=0,
            grid=grid,
            in_specs=in_specs,
            out_specs=pl.BlockSpec((bm, plain_p), lambda i: (i, 0)),
        ),
        compiler_params=pltpu.CompilerParams(
            dimension_semantics=("parallel",)),
        cost_estimate=pl.CostEstimate(
            flops=flops,
            transcendentals=Bp * plain,
            bytes_accessed=bytes_accessed),
    )(*operands)

    # NOTE: one small slice copy per call; callers tolerant of a lane-padded
    # plain dim can consume out_p directly.
    return out_p[:B, :plain]


def init_params(key, cipher, hidden, plain, depth):
    """Deterministic init mimicking nn.Linear (uniform +/- 1/sqrt(fan_in)).
    Weights stored transposed from PyTorch as [in, out]."""
    ks = jax.random.split(key, 3)

    def lin(k, fan_in, fan_out):
        kw, kb = jax.random.split(k)
        bound = 1.0 / math.sqrt(fan_in)
        w = jax.random.uniform(kw, (fan_in, fan_out), jnp.float32, -bound, bound)
        b = jax.random.uniform(kb, (1, fan_out), jnp.float32, -bound, bound)
        return w, b

    w_in, b_in = lin(ks[0], cipher, hidden)

    n_mlp = depth - 1
    if n_mlp > 0:
        kmlp = jax.random.split(ks[1], n_mlp)
        ws, bs = [], []
        for d in range(n_mlp):
            w, b = lin(kmlp[d], hidden, hidden)
            ws.append(w)
            bs.append(b.reshape(1, 1, hidden))
        w_mlp = jnp.stack(ws, axis=0)              # [depth-1, H, H]
        b_mlp = jnp.concatenate(bs, axis=0)        # [depth-1, 1, H]
    else:
        w_mlp = None
        b_mlp = None

    w_out, b_out = lin(ks[2], hidden, plain)
    return w_in, b_in, w_mlp, b_mlp, w_out, b_out


def eve_reference(x, params, *, depth):
    """Pure-JAX reference matching the PyTorch forward exactly."""
    w_in, b_in, w_mlp, b_mlp, w_out, b_out = params
    h = jax.nn.relu(x @ w_in + b_in)
    for d in range(depth - 1):
        h = jax.nn.relu(h + h @ w_mlp[d] + b_mlp[d])
    return jnp.tanh(h @ w_out + b_out)


if __name__ == "__main__":
    # module config: {'cipher': 16, 'plain': 16, 'eve': {'hidden': 32, 'depth': 3}}
    B, CIPHER, HIDDEN, PLAIN, DEPTH = 512, 16, 32, 16, 3

    key = jax.random.PRNGKey(0)
    k_x, k_p = jax.random.split(key)
    x = jax.random.normal(k_x, (B, CIPHER), jnp.float32)
    params = init_params(k_p, CIPHER, HIDDEN, PLAIN, DEPTH)
    ref = eve_reference(x, params, depth=DEPTH)

    # f32 operand path (exact): one-time prepare, jitted forward, grid=(1,)
    prep_f32 = prepare_params(params, depth=DEPTH, use_bf16=False)
    fwd_f32 = jax.jit(functools.partial(eve_forward, depth=DEPTH, plain=PLAIN))
    out = jax.block_until_ready(fwd_f32(x, prep_f32))
    assert out.shape == (B, PLAIN)
    assert jnp.allclose(out, ref, atol=1e-5, rtol=1e-5), "f32 mismatch vs reference"

    # bf16 operand default (halves matmul operand DMA; f32 accumulation)
    prep_bf16 = prepare_params(params, depth=DEPTH, use_bf16=True)
    fwd_bf16 = jax.jit(functools.partial(eve_forward, depth=DEPTH, plain=PLAIN))
    out_bf = jax.block_until_ready(fwd_bf16(x, prep_bf16))
    assert out_bf.shape == (B, PLAIN)
    assert float(jnp.max(jnp.abs(out_bf - ref))) < 0.1, "bf16 mismatch vs reference"

    # tiled-batch knob (e.g. for a measured v7x 2-TC split): block_m=256 -> grid=(2,)
    fwd_tiled = jax.jit(functools.partial(eve_forward, depth=DEPTH, plain=PLAIN,
                                          block_m=256))
    out_t = jax.block_until_ready(fwd_tiled(x, prep_f32))
    assert jnp.allclose(out_t, ref, atol=1e-5, rtol=1e-5), "tiled mismatch"

    # depth == 1 edge case + ragged batch: grid=(1,), no batch padding,
    # no dummy MLP operands are DMA'd.
    B1, D1 = 77, 1
    x1 = jax.random.normal(jax.random.PRNGKey(1), (B1, CIPHER), jnp.float32)
    params1 = init_params(jax.random.PRNGKey(2), CIPHER, HIDDEN, PLAIN, D1)
    prep1 = prepare_params(params1, depth=D1, use_bf16=False)
    fwd1 = jax.jit(functools.partial(eve_forward, depth=D1, plain=PLAIN))
    out1 = jax.block_until_ready(fwd1(x1, prep1))
    ref1 = eve_reference(x1, params1, depth=D1)
    assert out1.shape == (B1, PLAIN)
    assert jnp.allclose(out1, ref1, atol=1e-5, rtol=1e-5), "depth=1 mismatch"

    print("KERNEL_OK")
</pallas_src>

<mosaic_0001>
module attributes {stable_mosaic.version = 11 : i64} {
  func.func @_eve_kernel(%arg0: i32, %arg1: memref<512x16xf32, #tpu.memory_space<vmem>>, %arg2: memref<16x32xf32, #tpu.memory_space<vmem>>, %arg3: memref<1x32xf32, #tpu.memory_space<vmem>>, %arg4: memref<2x32x32xf32, #tpu.memory_space<vmem>>, %arg5: memref<2x1x32xf32, #tpu.memory_space<vmem>>, %arg6: memref<32x128xf32, #tpu.memory_space<vmem>>, %arg7: memref<1x128xf32, #tpu.memory_space<vmem>>, %arg8: memref<512x128xf32, #tpu.memory_space<vmem>>) attributes {dimension_semantics = [#tpu.dimension_semantics<parallel>], iteration_bounds = array<i64: 1>, scalar_prefetch = 0 : i64, scratch_operands = 0 : i64, tpu.core_type = #tpu.core_type<tc>, window_params = [{transform_indices = @transform_0, window_bounds = array<i64: 512, 16>}, {pipeline_mode = #tpu.pipeline_mode<synchronous>, transform_indices = @transform_1, window_bounds = array<i64: 16, 32>}, {pipeline_mode = #tpu.pipeline_mode<synchronous>, transform_indices = @transform_2, window_bounds = array<i64: 1, 32>}, {pipeline_mode = #tpu.pipeline_mode<synchronous>, transform_indices = @transform_3, window_bounds = array<i64: 2, 32, 32>}, {pipeline_mode = #tpu.pipeline_mode<synchronous>, transform_indices = @transform_4, window_bounds = array<i64: 2, 1, 32>}, {pipeline_mode = #tpu.pipeline_mode<synchronous>, transform_indices = @transform_5, window_bounds = array<i64: 32, 128>}, {pipeline_mode = #tpu.pipeline_mode<synchronous>, transform_indices = @transform_6, window_bounds = array<i64: 1, 128>}, {transform_indices = @transform_7, window_bounds = array<i64: 512, 128>}]} {
    %c0 = arith.constant 0 : index
    %c0_0 = arith.constant 0 : index
    %0 = vector.load %arg1[%c0, %c0_0] : memref<512x16xf32, #tpu.memory_space<vmem>>, vector<512x16xf32>
    %c0_1 = arith.constant 0 : index
    %c0_2 = arith.constant 0 : index
    %1 = vector.load %arg2[%c0_1, %c0_2] : memref<16x32xf32, #tpu.memory_space<vmem>>, vector<16x32xf32>
    %cst = arith.constant dense<0.000000e+00> : vector<512x32xf32>
    %2 = tpu.matmul %0, %1, %cst {dimension_numbers = #tpu.dot_dimension_numbers<[1], [0], [0], [1], [0, 0, 1, 1], [], []>} : vector<512x16xf32>, vector<16x32xf32>, vector<512x32xf32> -> vector<512x32xf32>
    %c0_3 = arith.constant 0 : index
    %c0_4 = arith.constant 0 : index
    %3 = vector.load %arg3[%c0_3, %c0_4] : memref<1x32xf32, #tpu.memory_space<vmem>>, vector<1x32xf32>
    %4 = vector.broadcast %3 : vector<1x32xf32> to vector<512x32xf32>
    %5 = arith.addf %2, %4 : vector<512x32xf32>
    %cst_5 = arith.constant 0.000000e+00 : f32
    %6 = vector.broadcast %cst_5 : f32 to vector<512x32xf32>
    %7 = arith.maximumf %5, %6 : vector<512x32xf32>
    %c0_6 = arith.constant 0 : index
    %c0_7 = arith.constant 0 : index
    %c0_8 = arith.constant 0 : index
    %8 = vector.load %arg4[%c0_6, %c0_7, %c0_8] : memref<2x32x32xf32, #tpu.memory_space<vmem>>, vector<1x32x32xf32>
    %9 = vector.shape_cast %8 : vector<1x32x32xf32> to vector<32x32xf32>
    %cst_9 = arith.constant dense<0.000000e+00> : vector<512x32xf32>
    %10 = tpu.matmul %7, %9, %cst_9 {dimension_numbers = #tpu.dot_dimension_numbers<[1], [0], [0], [1], [0, 0, 1, 1], [], []>} : vector<512x32xf32>, vector<32x32xf32>, vector<512x32xf32> -> vector<512x32xf32>
    %11 = arith.addf %7, %10 : vector<512x32xf32>
    %c0_10 = arith.constant 0 : index
    %c0_11 = arith.constant 0 : index
    %c0_12 = arith.constant 0 : index
    %12 = vector.load %arg5[%c0_10, %c0_11, %c0_12] : memref<2x1x32xf32, #tpu.memory_space<vmem>>, vector<1x1x32xf32>
    %13 = vector.shape_cast %12 : vector<1x1x32xf32> to vector<1x32xf32>
    %14 = vector.broadcast %13 : vector<1x32xf32> to vector<512x32xf32>
    %15 = arith.addf %11, %14 : vector<512x32xf32>
    %cst_13 = arith.constant 0.000000e+00 : f32
    %16 = vector.broadcast %cst_13 : f32 to vector<512x32xf32>
    %17 = arith.maximumf %15, %16 : vector<512x32xf32>
    %c1 = arith.constant 1 : index
    %c0_14 = arith.constant 0 : index
    %c0_15 = arith.constant 0 : index
    %18 = vector.load %arg4[%c1, %c0_14, %c0_15] : memref<2x32x32xf32, #tpu.memory_space<vmem>>, vector<1x32x32xf32>
    %19 = vector.shape_cast %18 : vector<1x32x32xf32> to vector<32x32xf32>
    %cst_16 = arith.constant dense<0.000000e+00> : vector<512x32xf32>
    %20 = tpu.matmul %17, %19, %cst_16 {dimension_numbers = #tpu.dot_dimension_numbers<[1], [0], [0], [1], [0, 0, 1, 1], [], []>} : vector<512x32xf32>, vector<32x32xf32>, vector<512x32xf32> -> vector<512x32xf32>
    %21 = arith.addf %17, %20 : vector<512x32xf32>
    %c1_17 = arith.constant 1 : index
    %c0_18 = arith.constant 0 : index
    %c0_19 = arith.constant 0 : index
    %22 = vector.load %arg5[%c1_17, %c0_18, %c0_19] : memref<2x1x32xf32, #tpu.memory_space<vmem>>, vector<1x1x32xf32>
    %23 = vector.shape_cast %22 : vector<1x1x32xf32> to vector<1x32xf32>
    %24 = vector.broadcast %23 : vector<1x32xf32> to vector<512x32xf32>
    %25 = arith.addf %21, %24 : vector<512x32xf32>
    %cst_20 = arith.constant 0.000000e+00 : f32
    %26 = vector.broadcast %cst_20 : f32 to vector<512x32xf32>
    %27 = arith.maximumf %25, %26 : vector<512x32xf32>
    %c0_21 = arith.constant 0 : index
    %c0_22 = arith.constant 0 : index
    %28 = vector.load %arg6[%c0_21, %c0_22] : memref<32x128xf32, #tpu.memory_space<vmem>>, vector<32x128xf32>
    %cst_23 = arith.constant dense<0.000000e+00> : vector<512x128xf32>
    %29 = tpu.matmul %27, %28, %cst_23 {dimension_numbers = #tpu.dot_dimension_numbers<[1], [0], [0], [1], [0, 0, 1, 1], [], []>} : vector<512x32xf32>, vector<32x128xf32>, vector<512x128xf32> -> vector<512x128xf32>
    %c0_24 = arith.constant 0 : index
    %c0_25 = arith.constant 0 : index
    %30 = vector.load %arg7[%c0_24, %c0_25] : memref<1x128xf32, #tpu.memory_space<vmem>>, vector<1x128xf32>
    %31 = vector.broadcast %30 : vector<1x128xf32> to vector<512x128xf32>
    %32 = arith.addf %29, %31 : vector<512x128xf32>
    %33 = math.tanh %32 : vector<512x128xf32>
    %c0_26 = arith.constant 0 : index
    %c0_27 = arith.constant 0 : index
    %34 = vector.load %arg8[%c0_26, %c0_27] : memref<512x128xf32, #tpu.memory_space<vmem>>, vector<512x128xf32>
    tpu.vector_store %arg8[%c0_26, %c0_27], %33 {strides = array<i32>} : memref<512x128xf32, #tpu.memory_space<vmem>>, vector<512x128xf32>,
    return
  }
  func.func @transform_0(%arg0: i32) -> (i32, i32) {
    %c0_i32 = arith.constant 0 : i32
    %c0_i32_0 = arith.constant 0 : i32
    return %arg0, %c0_i32 : i32, i32
  }
  func.func @transform_1(%arg0: i32) -> (i32, i32) {
    %c0_i32 = arith.constant 0 : i32
    %c0_i32_0 = arith.constant 0 : i32
    %c0_i32_1 = arith.constant 0 : i32
    return %c0_i32, %c0_i32_0 : i32, i32
  }
  func.func @transform_2(%arg0: i32) -> (i32, i32) {
    %c0_i32 = arith.constant 0 : i32
    %c0_i32_0 = arith.constant 0 : i32
    %c0_i32_1 = arith.constant 0 : i32
    return %c0_i32, %c0_i32_0 : i32, i32
  }
  func.func @transform_3(%arg0: i32) -> (i32, i32, i32) {
    %c0_i32 = arith.constant 0 : i32
    %c0_i32_0 = arith.constant 0 : i32
    %c0_i32_1 = arith.constant 0 : i32
    %c0_i32_2 = arith.constant 0 : i32
    return %c0_i32, %c0_i32_0, %c0_i32_1 : i32, i32, i32
  }
  func.func @transform_4(%arg0: i32) -> (i32, i32, i32) {
    %c0_i32 = arith.constant 0 : i32
    %c0_i32_0 = arith.constant 0 : i32
    %c0_i32_1 = arith.constant 0 : i32
    %c0_i32_2 = arith.constant 0 : i32
    return %c0_i32, %c0_i32_0, %c0_i32_1 : i32, i32, i32
  }
  func.func @transform_5(%arg0: i32) -> (i32, i32) {
    %c0_i32 = arith.constant 0 : i32
    %c0_i32_0 = arith.constant 0 : i32
    %c0_i32_1 = arith.constant 0 : i32
    return %c0_i32, %c0_i32_0 : i32, i32
  }
  func.func @transform_6(%arg0: i32) -> (i32, i32) {
    %c0_i32 = arith.constant 0 : i32
    %c0_i32_0 = arith.constant 0 : i32
    %c0_i32_1 = arith.constant 0 : i32
    return %c0_i32, %c0_i32_0 : i32, i32
  }
  func.func @transform_7(%arg0: i32) -> (i32, i32) {
    %c0_i32 = arith.constant 0 : i32
    %c0_i32_0 = arith.constant 0 : i32
    return %arg0, %c0_i32 : i32, i32
  }
}

</mosaic_0001>

<bundles_post_ra>
// kernel: eve_forward.1
= control target key start
LH: loop header
LB: loop body
LE: loop exit
PB: predicated region body
PF: predicated region fallthrough
CT: control target
= control target key end

     0   :  { %vm96_vm0 = vcmask 130048   ;;  %vm566_vm1 = vcmask 261120   ;;  %s4619_s1 = inlined_call_operand.vmem [shape: f32[16,32], index: 1, kind: input, shape index: {}]   ;;  %s4620_s0 = inlined_call_operand.vmem [shape: f32[512,16], index: 0, kind: input, shape index: {}]   ;;  %s4621_s2 = inlined_call_operand.vmem [shape: f32[1,32], index: 2, kind: input, shape index: {}]   ;;  %s4622_s3 = inlined_call_operand.vmem [shape: f32[2,32,32], index: 3, kind: input, shape index: {}]   ;;  %s4623_s4 = inlined_call_operand.vmem [shape: f32[2,1,32], index: 4, kind: input, shape index: {}]   ;;  %s4624_s5 = inlined_call_operand.vmem [shape: f32[32,128], index: 5, kind: input, shape index: {}]   ;;  %s4625_s6 = inlined_call_operand.vmem [shape: f32[1,128], index: 6, kind: input, shape index: {}]   ;;  %s4626_s7 = inlined_call_operand.vmem [shape: f32[512,128], index: 7, kind: output, shape index: {}]  }
   0x1   :  { %v91_v0 = vld [vmem:[%s4619_s1 + $0x8] sm:$0xff]  ;;  %v90_v1 = vld [vmem:[%s4619_s1] sm:$0xff]  ;;  %v28_v4 = vld [vmem:[%s4620_s0 + $0x10] sm:$0xff] }
   0x2   :  { %303 = vmatpush.msra.mxu0 %v91_v0  ;;  %v26_v2 = vld [vmem:[%s4620_s0] sm:$0xff]  ;;  %v27_v3 = vld [vmem:[%s4620_s0 + $0x8] sm:$0xff]  ;;  %v29_v5 = vld [vmem:[%s4620_s0 + $0x18] sm:$0xff] }
   0x3   :  { %v30_v6 = vld [vmem:[%s4620_s0 + $0x20] sm:$0xff]  ;;  %v31_v7 = vld [vmem:[%s4620_s0 + $0x28] sm:$0xff]  ;;  %v32_v8 = vld [vmem:[%s4620_s0 + $0x30] sm:$0xff] }
   0x4   :  { %304 = vmatpush.msra.mxu0 %v90_v1  ;;  %v33_v9 = vld [vmem:[%s4620_s0 + $0x38] sm:$0xff]  ;;  %v34_v10 = vld [vmem:[%s4620_s0 + $0x40] sm:$0xff]  ;;  %v35_v11 = vld [vmem:[%s4620_s0 + $0x48] sm:$0xff] }
   0x5   :  { %2308 = vmatmul.msk.f32.vlgmr.msra.gmra.mxu0 %vm96_vm0, %v26_v2  ;;  %v36_v12 = vld [vmem:[%s4620_s0 + $0x50] sm:$0xff]  ;;  %v37_v13 = vld [vmem:[%s4620_s0 + $0x58] sm:$0xff]  ;;  %v38_v16 = vld [vmem:[%s4620_s0 + $0x60] sm:$0xff] }
   0x6   :  { %v565_v14 = vld [vmem:[%s4622_s3 + $0x18] sm:$0xff]  ;;  %v564_v15 = vld [vmem:[%s4622_s3 + $0x10] sm:$0xff]  ;;  %v563_v17 = vld [vmem:[%s4622_s3 + $0x8] sm:$0xff] }
   0x7   :  { %771 = vmatpush.msra.mxu1 %v565_v14  ;;  %v562_v18 = vld [vmem:[%s4622_s3] sm:$0xff]  ;;  %v39_v19 = vld [vmem:[%s4620_s0 + $0x68] sm:$0xff]  ;;  %v40_v20 = vld [vmem:[%s4620_s0 + $0x70] sm:$0xff] }
   0x8   :  { %v41_v21 = vld [vmem:[%s4620_s0 + $0x78] sm:$0xff]  ;;  %v2830_v22 = vld [vmem:[%s4621_s2] ss:$0 sm:$0xff]  ;;  %v43_v28 = vld [vmem:[%s4620_s0 + $0x88] sm:$0xff] }
   0x9   :  { %772 = vmatpush.msra.mxu1 %v564_v15  ;;  %v42_v24 = vld [vmem:[%s4620_s0 + $0x80] sm:$0xff]  ;;  %v44_v32 = vld [vmem:[%s4620_s0 + $0x90] sm:$0xff]  ;;  %v45_v36 = vld [vmem:[%s4620_s0 + $0x98] sm:$0xff] }
   0xa   :  { %v46_v40 = vld [vmem:[%s4620_s0 + $0xa0] sm:$0xff]  ;;  %v47_v44 = vld [vmem:[%s4620_s0 + $0xa8] sm:$0xff]  ;;  %v48_v48 = vld [vmem:[%s4620_s0 + $0xb0] sm:$0xff] }
   0xb   :  { %773 = vmatpush.msra.mxu1 %v563_v17  ;;  %v49_v52 = vld [vmem:[%s4620_s0 + $0xb8] sm:$0xff]  ;;  %v50_v56 = vld [vmem:[%s4620_s0 + $0xc0] sm:$0xff]  ;;  %v51_v60 = vld [vmem:[%s4620_s0 + $0xc8] sm:$0xff] }
   0xc   :  { %v52_v0 = vld [vmem:[%s4620_s0 + $0xd0] sm:$0xff]  ;;  %v2436_v14 = vld [vmem:[%s4622_s3 + $0x20] sm:$0xff] }
   0xd   :  { %2309 = vmatmul.msk.f32.gmra.mxu0 %vm96_vm0, %v27_v3  ;;  %774 = vmatpush.msra.mxu1 %v562_v18 }
  0x15   :  { %2310 = vmatmul.msk.f32.gmra.mxu0 %vm96_vm0, %v28_v4  ;;  %v53_v4 = vld [vmem:[%s4620_s0 + $0xd8] sm:$0xff] }
  0x1d   :  { %2311 = vmatmul.msk.f32.gmra.mxu0 %vm96_vm0, %v29_v5 }
  0x25   :  { %2312 = vmatmul.msk.f32.gmra.mxu0 %vm96_vm0, %v30_v6 }
  0x2d   :  { %2313 = vmatmul.msk.f32.gmra.mxu0 %vm96_vm0, %v31_v7 }
  0x35   :  { %2314 = vmatmul.msk.f32.gmra.mxu0 %vm96_vm0, %v32_v8  ;;  %v54_v8 = vld [vmem:[%s4620_s0 + $0xe0] sm:$0xff] }
  0x3d   :  { %2315 = vmatmul.msk.f32.gmra.mxu0 %vm96_vm0, %v33_v9 }
  0x45   :  { %2316 = vmatmul.msk.f32.gmra.mxu0 %vm96_vm0, %v34_v10  ;;  %v2439_v10 = vld [vmem:[%s4622_s3 + $0x38] sm:$0xff] }
  0x46   :  { %1373 = vmatpush.msra.mxu2 %v2439_v10 }
  0x4d   :  { %2317 = vmatmul.msk.f32.gmra.mxu0 %vm96_vm0, %v35_v11 }
  0x55   :  { %2318 = vmatmul.msk.f32.gmra.mxu0 %vm96_vm0, %v36_v12  ;;  %v2438_v12 = vld [vmem:[%s4622_s3 + $0x30] sm:$0xff] }
  0x56   :  { %1374 = vmatpush.msra.mxu2 %v2438_v12  ;;  %v61_v12 = vld [vmem:[%s4620_s0 + $0x118] sm:$0xff] }
  0x5d   :  { %2319 = vmatmul.msk.f32.gmra.mxu0 %vm96_vm0, %v37_v13  ;;  %v2437_v13 = vld [vmem:[%s4622_s3 + $0x28] sm:$0xff] }
  0x5e   :  { %1375 = vmatpush.msra.mxu2 %v2437_v13 }
  0x60   :  { %1376 = vmatpush.msra.mxu2 %v2436_v14 }
  0x65   :  { %2320 = vmatmul.msk.f32.gmra.mxu0 %vm96_vm0, %v38_v16  ;;  %v55_v16 = vld [vmem:[%s4620_s0 + $0xe8] sm:$0xff] }
  0x6d   :  { %2321 = vmatmul.msk.f32.gmra.mxu0 %vm96_vm0, %v39_v19 }
  0x75   :  { %2322 = vmatmul.msk.f32.gmra.mxu0 %vm96_vm0, %v40_v20  ;;  %v56_v20 = vld [vmem:[%s4620_s0 + $0xf0] sm:$0xff] }
  0x7d   :  { %2323 = vmatmul.msk.f32.gmra.mxu0 %vm96_vm0, %v41_v21 }
  0x82   :  { %v306_v23 = vpop.f32.mrf.mxu0 }
  0x83   :  { %v2836_v25 = vadd.f32 %v2830_v22, %v306_v23 }
  0x85   :  { %v498_v26 = vmax.f32 %v2836_v25, 0.0  ;;  %2324 = vmatmul.msk.f32.gmra.mxu0 %vm96_vm0, %v42_v24 }
  0x87   :  { %2372 = vmatmul.msk.f32.vlgmr.msra.gmra.mxu1 %vm566_vm1, %v498_v26 }
  0x8a   :  { %v309_v27 = vpop.f32.mrf.mxu0 }
  0x8b   :  { %v2847_v29 = vadd.f32 %v2830_v22, %v309_v27  ;;  %v57_v27 = vld [vmem:[%s4620_s0 + $0xf8] sm:$0xff] }
  0x8d   :  { %v499_v30 = vmax.f32 %v2847_v29, 0.0  ;;  %2325 = vmatmul.msk.f32.gmra.mxu0 %vm96_vm0, %v43_v28 }
  0x8f   :  { %2373 = vmatmul.msk.f32.gmra.mxu1 %vm566_vm1, %v499_v30 }
  0x92   :  { %v312_v31 = vpop.f32.mrf.mxu0 }
  0x93   :  { %v2858_v33 = vadd.f32 %v2830_v22, %v312_v31 }
  0x95   :  { %v500_v34 = vmax.f32 %v2858_v33, 0.0  ;;  %2326 = vmatmul.msk.f32.gmra.mxu0 %vm96_vm0, %v44_v32 }
  0x97   :  { %2374 = vmatmul.msk.f32.gmra.mxu1 %vm566_vm1, %v500_v34 }
  0x9a   :  { %v315_v35 = vpop.f32.mrf.mxu0 }
  0x9b   :  { %v2869_v37 = vadd.f32 %v2830_v22, %v315_v35  ;;  %v58_v35 = vld [vmem:[%s4620_s0 + $0x100] sm:$0xff] }
  0x9d   :  { %v501_v38 = vmax.f32 %v2869_v37, 0.0  ;;  %2327 = vmatmul.msk.f32.gmra.mxu0 %vm96_vm0, %v45_v36 }
  0x9f   :  { %2375 = vmatmul.msk.f32.gmra.mxu1 %vm566_vm1, %v501_v38 }
  0xa2   :  { %v318_v39 = vpop.f32.mrf.mxu0 }
  0xa3   :  { %v2880_v41 = vadd.f32 %v2830_v22, %v318_v39  ;;  %v3029_v39 = vld [vmem:[%s4623_s4] ss:$0 sm:$0xff] }
  0xa5   :  { %v502_v42 = vmax.f32 %v2880_v41, 0.0  ;;  %2328 = vmatmul.msk.f32.gmra.mxu0 %vm96_vm0, %v46_v40 }
  0xa7   :  { %2376 = vmatmul.msk.f32.gmra.mxu1 %vm566_vm1, %v502_v42 }
  0xaa   :  { %v321_v43 = vpop.f32.mrf.mxu0 }
  0xab   :  { %v2891_v45 = vadd.f32 %v2830_v22, %v321_v43 }
  0xad   :  { %v503_v46 = vmax.f32 %v2891_v45, 0.0  ;;  %2329 = vmatmul.msk.f32.gmra.mxu0 %vm96_vm0, %v47_v44 }
  0xaf   :  { %2377 = vmatmul.msk.f32.gmra.mxu1 %vm566_vm1, %v503_v46 }
  0xb2   :  { %v324_v47 = vpop.f32.mrf.mxu0 }
  0xb3   :  { %v2902_v49 = vadd.f32 %v2830_v22, %v324_v47 }
  0xb5   :  { %v504_v50 = vmax.f32 %v2902_v49, 0.0  ;;  %2330 = vmatmul.msk.f32.gmra.mxu0 %vm96_vm0, %v48_v48 }
  0xb7   :  { %2378 = vmatmul.msk.f32.gmra.mxu1 %vm566_vm1, %v504_v50 }
  0xba   :  { %v327_v51 = vpop.f32.mrf.mxu0 }
  0xbb   :  { %v2913_v53 = vadd.f32 %v2830_v22, %v327_v51 }
  0xbd   :  { %v505_v54 = vmax.f32 %v2913_v53, 0.0  ;;  %2331 = vmatmul.msk.f32.gmra.mxu0 %vm96_vm0, %v49_v52  ;;  %v59_v52 = vld [vmem:[%s4620_s0 + $0x108] sm:$0xff] }
  0xbf   :  { %2379 = vmatmul.msk.f32.gmra.mxu1 %vm566_vm1, %v505_v54 }
  0xc2   :  { %v330_v55 = vpop.f32.mrf.mxu0 }
  0xc3   :  { %v2924_v57 = vadd.f32 %v2830_v22, %v330_v55 }
  0xc5   :  { %v506_v58 = vmax.f32 %v2924_v57, 0.0  ;;  %2332 = vmatmul.msk.f32.gmra.mxu0 %vm96_vm0, %v50_v56 }
  0xc7   :  { %2380 = vmatmul.msk.f32.gmra.mxu1 %vm566_vm1, %v506_v58 }
  0xca   :  { %v333_v59 = vpop.f32.mrf.mxu0 }
  0xcb   :  { %v2935_v61 = vadd.f32 %v2830_v22, %v333_v59 }
  0xcd   :  { %v507_v62 = vmax.f32 %v2935_v61, 0.0  ;;  %2333 = vmatmul.msk.f32.gmra.mxu0 %vm96_vm0, %v51_v60 }
  0xcf   :  { %2381 = vmatmul.msk.f32.gmra.mxu1 %vm566_vm1, %v507_v62 }
  0xd2   :  { %v336_v63 = vpop.f32.mrf.mxu0 }
  0xd3   :  { %v2946_v1 = vadd.f32 %v2830_v22, %v336_v63 }
  0xd5   :  { %v508_v2 = vmax.f32 %v2946_v1, 0.0  ;;  %2334 = vmatmul.msk.f32.gmra.mxu0 %vm96_vm0, %v52_v0  ;;  %v60_v0 = vld [vmem:[%s4620_s0 + $0x110] sm:$0xff] }
  0xd7   :  { %2382 = vmatmul.msk.f32.gmra.mxu1 %vm566_vm1, %v508_v2 }
  0xda   :  { %v339_v3 = vpop.f32.mrf.mxu0 }
  0xdb   :  { %v2957_v5 = vadd.f32 %v2830_v22, %v339_v3 }
  0xdd   :  { %v509_v6 = vmax.f32 %v2957_v5, 0.0  ;;  %2335 = vmatmul.msk.f32.gmra.mxu0 %vm96_vm0, %v53_v4 }
  0xdf   :  { %2383 = vmatmul.msk.f32.gmra.mxu1 %vm566_vm1, %v509_v6 }
  0xe2   :  { %v342_v7 = vpop.f32.mrf.mxu0 }
  0xe3   :  { %v2968_v9 = vadd.f32 %v2830_v22, %v342_v7 }
  0xe5   :  { %v510_v11 = vmax.f32 %v2968_v9, 0.0  ;;  %2336 = vmatmul.msk.f32.gmra.mxu0 %vm96_vm0, %v54_v8 }
  0xe7   :  { %2384 = vmatmul.msk.f32.gmra.mxu1 %vm566_vm1, %v510_v11 }
  0xea   :  { %v345_v15 = vpop.f32.mrf.mxu0 }
  0xeb   :  { %v2991_v17 = vadd.f32 %v2830_v22, %v345_v15 }
  0xed   :  { %v511_v18 = vmax.f32 %v2991_v17, 0.0  ;;  %2337 = vmatmul.msk.f32.gmra.mxu0 %vm96_vm0, %v55_v16 }
  0xef   :  { %2385 = vmatmul.msk.f32.gmra.mxu1 %vm566_vm1, %v511_v18 }
  0xf2   :  { %v348_v19 = vpop.f32.mrf.mxu0 }
  0xf3   :  { %v3002_v21 = vadd.f32 %v2830_v22, %v348_v19 }
  0xf5   :  { %v512_v23 = vmax.f32 %v3002_v21, 0.0  ;;  %2338 = vmatmul.msk.f32.gmra.mxu0 %vm96_vm0, %v56_v20  ;;  %v62_v20 = vld [vmem:[%s4620_s0 + $0x120] sm:$0xff] }
  0xf7   :  { %2386 = vmatmul.msk.f32.gmra.mxu1 %vm566_vm1, %v512_v23 }
  0xfa   :  { %v351_v24 = vpop.f32.mrf.mxu0 }
  0xfb   :  { %v3013_v28 = vadd.f32 %v2830_v22, %v351_v24 }
  0xfd   :  { %v513_v31 = vmax.f32 %v3013_v28, 0.0  ;;  %2339 = vmatmul.msk.f32.gmra.mxu0 %vm96_vm0, %v57_v27 }
  0xff   :  { %2387 = vmatmul.msk.f32.gmra.mxu1 %vm566_vm1, %v513_v31 }
 0x102   :  { %v354_v32 = vpop.f32.mrf.mxu0 }
 0x103   :  { %v3024_v36 = vadd.f32 %v2830_v22, %v354_v32 }
 0x104   :  { %v776_v40 = vpop.f32.mrf.mxu1 }
 0x105   :  { %v514_v43 = vmax.f32 %v3024_v36, 0.0  ;;  %v968_v44 = vadd.f32 %v776_v40, %v498_v26  ;;  %2340 = vmatmul.msk.f32.gmra.mxu0 %vm96_vm0, %v58_v35 }
 0x107   :  { %v3036_v47 = vadd.f32 %v3029_v39, %v968_v44  ;;  %2388 = vmatmul.msk.f32.gmra.mxu1 %vm566_vm1, %v514_v43  ;;  %v63_v44 = vld [vmem:[%s4620_s0 + $0x128] sm:$0xff] }
 0x109   :  { %v1100_v48 = vmax.f32 %v3036_v47, 0.0 }
 0x10a   :  { %v357_v51 = vpop.f32.mrf.mxu0 }
 0x10b   :  { %v3046_v55 = vadd.f32 %v2830_v22, %v357_v51  ;;  %2440 = vmatmul.msk.f32.vlgmr.msra.gmra.mxu2 %vm566_vm1, %v1100_v48 }
 0x10c   :  { %v779_v25 = vpop.f32.mrf.mxu1 }
 0x10d   :  { %v515_v26 = vmax.f32 %v3046_v55, 0.0  ;;  %v969_v56 = vadd.f32 %v779_v25, %v499_v30  ;;  %2341 = vmatmul.msk.f32.gmra.mxu0 %vm96_vm0, %v59_v52 }
 0x10f   :  { %v3056_v59 = vadd.f32 %v3029_v39, %v969_v56  ;;  %2389 = vmatmul.msk.f32.gmra.mxu1 %vm566_vm1, %v515_v26 }
 0x111   :  { %v1101_v60 = vmax.f32 %v3056_v59, 0.0 }
 0x112   :  { %v360_v63 = vpop.f32.mrf.mxu0 }
 0x113   :  { %v3066_v3 = vadd.f32 %v2830_v22, %v360_v63  ;;  %2441 = vmatmul.msk.f32.gmra.mxu2 %vm566_vm1, %v1101_v60 }
 0x114   :  { %v782_v29 = vpop.f32.mrf.mxu1 }
 0x115   :  { %v516_v30 = vmax.f32 %v3066_v3, 0.0  ;;  %v970_v4 = vadd.f32 %v782_v29, %v500_v34  ;;  %2342 = vmatmul.msk.f32.gmra.mxu0 %vm96_vm0, %v60_v0  ;;  %v64_v0 = vld [vmem:[%s4620_s0 + $0x130] sm:$0xff] }
 0x117   :  { %v3076_v7 = vadd.f32 %v3029_v39, %v970_v4  ;;  %2390 = vmatmul.msk.f32.gmra.mxu1 %vm566_vm1, %v516_v30 }
 0x119   :  { %v1102_v8 = vmax.f32 %v3076_v7, 0.0 }
 0x11a   :  { %v363_v10 = vpop.f32.mrf.mxu0 }
 0x11b   :  { %v3086_v13 = vadd.f32 %v2830_v22, %v363_v10  ;;  %2442 = vmatmul.msk.f32.gmra.mxu2 %vm566_vm1, %v1102_v8 }
 0x11c   :  { %v785_v33 = vpop.f32.mrf.mxu1 }
 0x11d   :  { %v517_v34 = vmax.f32 %v3086_v13, 0.0  ;;  %v971_v14 = vadd.f32 %v785_v33, %v501_v38  ;;  %2343 = vmatmul.msk.f32.gmra.mxu0 %vm96_vm0, %v61_v12 }
 0x11f   :  { %v3096_v15 = vadd.f32 %v3029_v39, %v971_v14  ;;  %2391 = vmatmul.msk.f32.gmra.mxu1 %vm566_vm1, %v517_v34  ;;  %v65_v14 = vld [vmem:[%s4620_s0 + $0x138] sm:$0xff] }
 0x121   :  { %v1103_v16 = vmax.f32 %v3096_v15, 0.0 }
 0x122   :  { %v366_v19 = vpop.f32.mrf.mxu0 }
 0x123   :  { %v3106_v24 = vadd.f32 %v2830_v22, %v366_v19  ;;  %2443 = vmatmul.msk.f32.gmra.mxu2 %vm566_vm1, %v1103_v16 }
 0x124   :  { %v788_v37 = vpop.f32.mrf.mxu1 }
 0x125   :  { %v518_v38 = vmax.f32 %v3106_v24, 0.0  ;;  %v972_v27 = vadd.f32 %v788_v37, %v502_v42  ;;  %2344 = vmatmul.msk.f32.gmra.mxu0 %vm96_vm0, %v62_v20 }
 0x127   :  { %v3116_v32 = vadd.f32 %v3029_v39, %v972_v27  ;;  %2392 = vmatmul.msk.f32.gmra.mxu1 %vm566_vm1, %v518_v38 }
 0x129   :  { %v1104_v35 = vmax.f32 %v3116_v32, 0.0 }
 0x12a   :  { %v369_v40 = vpop.f32.mrf.mxu0 }
 0x12b   :  { %v3126_v51 = vadd.f32 %v2830_v22, %v369_v40  ;;  %2444 = vmatmul.msk.f32.gmra.mxu2 %vm566_vm1, %v1104_v35 }
 0x12c   :  { %v791_v41 = vpop.f32.mrf.mxu1 }
 0x12d   :  { %v519_v42 = vmax.f32 %v3126_v51, 0.0  ;;  %v973_v52 = vadd.f32 %v791_v41, %v503_v46  ;;  %2345 = vmatmul.msk.f32.gmra.mxu0 %vm96_vm0, %v63_v44  ;;  %v66_v44 = vld [vmem:[%s4620_s0 + $0x140] sm:$0xff] }
 0x12f   :  { %v3136_v25 = vadd.f32 %v3029_v39, %v973_v52  ;;  %2393 = vmatmul.msk.f32.gmra.mxu1 %vm566_vm1, %v519_v42 }
 0x131   :  { %v1105_v56 = vmax.f32 %v3136_v25, 0.0 }
 0x132   :  { %v372_v63 = vpop.f32.mrf.mxu0 }
 0x133   :  { %v3146_v29 = vadd.f32 %v2830_v22, %v372_v63  ;;  %2445 = vmatmul.msk.f32.gmra.mxu2 %vm566_vm1, %v1105_v56 }
 0x134   :  { %v794_v45 = vpop.f32.mrf.mxu1 }
 0x135   :  { %v520_v46 = vmax.f32 %v3146_v29, 0.0  ;;  %v974_v4 = vadd.f32 %v794_v45, %v504_v50  ;;  %2346 = vmatmul.msk.f32.gmra.mxu0 %vm96_vm0, %v64_v0 }
 0x137   :  { %v3156_v10 = vadd.f32 %v3029_v39, %v974_v4  ;;  %2394 = vmatmul.msk.f32.gmra.mxu1 %vm566_vm1, %v520_v46  ;;  %v67_v4 = vld [vmem:[%s4620_s0 + $0x148] sm:$0xff] }
 0x139   :  { %v1106_v12 = vmax.f32 %v3156_v10, 0.0 }
 0x13a   :  { %v375_v33 = vpop.f32.mrf.mxu0 }
 0x13b   :  { %v3166_v19 = vadd.f32 %v2830_v22, %v375_v33  ;;  %2446 = vmatmul.msk.f32.gmra.mxu2 %vm566_vm1, %v1106_v12 }
 0x13c   :  { %v797_v49 = vpop.f32.mrf.mxu1 }
 0x13d   :  { %v521_v50 = vmax.f32 %v3166_v19, 0.0  ;;  %v975_v20 = vadd.f32 %v797_v49, %v505_v54  ;;  %2347 = vmatmul.msk.f32.gmra.mxu0 %vm96_vm0, %v65_v14 }
 0x13f   :  { %v3176_v37 = vadd.f32 %v3029_v39, %v975_v20  ;;  %2395 = vmatmul.msk.f32.gmra.mxu1 %vm566_vm1, %v521_v50 }
 0x141   :  { %v1107_v27 = vmax.f32 %v3176_v37, 0.0 }
 0x142   :  { %v378_v40 = vpop.f32.mrf.mxu0 }
 0x143   :  { %v3186_v41 = vadd.f32 %v2830_v22, %v378_v40  ;;  %2447 = vmatmul.msk.f32.gmra.mxu2 %vm566_vm1, %v1107_v27 }
 0x144   :  { %v800_v53 = vpop.f32.mrf.mxu1 }
 0x145   :  { %v522_v54 = vmax.f32 %v3186_v41, 0.0  ;;  %v976_v52 = vadd.f32 %v800_v53, %v506_v58  ;;  %2348 = vmatmul.msk.f32.gmra.mxu0 %vm96_vm0, %v66_v44  ;;  %v68_v44 = vld [vmem:[%s4620_s0 + $0x150] sm:$0xff] }
 0x147   :  { %v3196_v63 = vadd.f32 %v3029_v39, %v976_v52  ;;  %2396 = vmatmul.msk.f32.gmra.mxu1 %vm566_vm1, %v522_v54 }
 0x149   :  { %v1108_v0 = vmax.f32 %v3196_v63, 0.0 }
 0x14a   :  { %v381_v45 = vpop.f32.mrf.mxu0 }
 0x14b   :  { %v3206_v33 = vadd.f32 %v2830_v22, %v381_v45  ;;  %2448 = vmatmul.msk.f32.gmra.mxu2 %vm566_vm1, %v1108_v0 }
 0x14c   :  { %v803_v57 = vpop.f32.mrf.mxu1 }
 0x14d   :  { %v523_v58 = vmax.f32 %v3206_v33, 0.0  ;;  %v977_v14 = vadd.f32 %v803_v57, %v507_v62  ;;  %2349 = vmatmul.msk.f32.gmra.mxu0 %vm96_vm0, %v67_v4 }
 0x14f   :  { %v3216_v49 = vadd.f32 %v3029_v39, %v977_v14  ;;  %2397 = vmatmul.msk.f32.gmra.mxu1 %vm566_vm1, %v523_v58  ;;  %v69_v14 = vld [vmem:[%s4620_s0 + $0x158] sm:$0xff] }
 0x151   :  { %v4628_v20 = vmax.f32 %v3216_v49, 0.0 }
 0x152   :  { %v384_v40 = vpop.f32.mrf.mxu0 }
 0x153   :  { %v3226_v53 = vadd.f32 %v2830_v22, %v384_v40  ;;  %2449 = vmatmul.msk.f32.gmra.mxu2 %vm566_vm1, %v4628_v20 }
 0x154   :  { %v806_v61 = vpop.f32.mrf.mxu1 }
 0x155   :  { %v524_v62 = vmax.f32 %v3226_v53, 0.0  ;;  %v978_v52 = vadd.f32 %v806_v61, %v508_v2  ;;  %2350 = vmatmul.msk.f32.gmra.mxu0 %vm96_vm0, %v68_v44 }
 0x157   :  { %v3236_v45 = vadd.f32 %v3029_v39, %v978_v52  ;;  %2398 = vmatmul.msk.f32.gmra.mxu1 %vm566_vm1, %v524_v62 }
 0x159   :  { %v4627_v4 = vmax.f32 %v3236_v45, 0.0 }
 0x15a   :  { %v387_v57 = vpop.f32.mrf.mxu0 }
 0x15b   :  { %v3246_v40 = vadd.f32 %v2830_v22, %v387_v57  ;;  %2450 = vmatmul.msk.f32.gmra.mxu2 %vm566_vm1, %v4627_v4  ;;  %v70_v4 = vld [vmem:[%s4620_s0 + $0x160] sm:$0xff] }
 0x15c   :  { %v809_v1 = vpop.f32.mrf.mxu1 }
 0x15d   :  { %v4630_v2 = vmax.f32 %v3246_v40, 0.0  ;;  %v979_v44 = vadd.f32 %v809_v1, %v509_v6  ;;  %2351 = vmatmul.msk.f32.gmra.mxu0 %vm96_vm0, %v69_v14 }
 0x15f   :  { %v3256_v61 = vadd.f32 %v3029_v39, %v979_v44  ;;  %2399 = vmatmul.msk.f32.gmra.mxu1 %vm566_vm1, %v4630_v2 }
 0x161   :  { %v4629_v52 = vmax.f32 %v3256_v61, 0.0 }
 0x162   :  { %v390_v57 = vpop.f32.mrf.mxu0 }
 0x163   :  { %v3266_v20 = vadd.f32 %v2830_v22, %v390_v57  ;;  %2451 = vmatmul.msk.f32.gmra.mxu2 %vm566_vm1, %v4629_v52  ;;  %v71_v52 = vld [vmem:[%s4620_s0 + $0x168] sm:$0xff] }
 0x164   :  { %v812_v5 = vpop.f32.mrf.mxu1 }
 0x165   :  { %v4634_v6 = vmax.f32 %v3266_v20, 0.0  ;;  %v980_v14 = vadd.f32 %v812_v5, %v510_v11  ;;  %2352 = vmatmul.msk.f32.gmra.mxu0 %vm96_vm0, %v70_v4  ;;  %v1770_v5 = vld [vmem:[%s4624_s5 + $0x18] sm:$0xff] }
 0x166   :  { %1979 = vmatpush.msra.mxu3 %v1770_v5  ;;  %v1767_v5 = vld [vmem:[%s4624_s5] sm:$0xff] }
 0x167   :  { %v3276_v1 = vadd.f32 %v3029_v39, %v980_v14  ;;  %2400 = vmatmul.msk.f32.gmra.mxu1 %vm566_vm1, %v4634_v6 }
 0x169   :  { %v4631_v44 = vmax.f32 %v3276_v1, 0.0 }
 0x16a   :  { %v393_v57 = vpop.f32.mrf.mxu0 }
 0x16b   :  { %v3286_v2 = vadd.f32 %v2830_v22, %v393_v57  ;;  %2452 = vmatmul.msk.f32.gmra.mxu2 %vm566_vm1, %v4631_v44  ;;  %v1769_v57 = vld [vmem:[%s4624_s5 + $0x10] sm:$0xff] }
 0x16c   :  { %v815_v9 = vpop.f32.mrf.mxu1  ;;  %1980 = vmatpush.msra.mxu3 %v1769_v57 }
 0x16d   :  { %v4632_v11 = vmax.f32 %v3286_v2, 0.0  ;;  %v981_v4 = vadd.f32 %v815_v9, %v511_v18  ;;  %2353 = vmatmul.msk.f32.gmra.mxu0 %vm96_vm0, %v71_v52  ;;  %v1768_v18 = vld [vmem:[%s4624_s5 + $0x8] sm:$0xff]  ;;  %v72_v9 = vld [vmem:[%s4620_s0 + $0x170] sm:$0xff] }
 0x16e   :  { %1981 = vmatpush.msra.mxu3 %v1768_v18 }
 0x16f   :  { %v3299_v14 = vadd.f32 %v3029_v39, %v981_v4  ;;  %2401 = vmatmul.msk.f32.gmra.mxu1 %vm566_vm1, %v4632_v11 }
 0x170   :  { %1982 = vmatpush.msra.mxu3 %v1767_v5  ;;  %v73_v5 = vld [vmem:[%s4620_s0 + $0x178] sm:$0xff] }
 0x171   :  { %v4633_v17 = vmax.f32 %v3299_v14, 0.0 }
 0x172   :  { %v396_v52 = vpop.f32.mrf.mxu0 }
 0x173   :  { %v3315_v4 = vadd.f32 %v2830_v22, %v396_v52  ;;  %2453 = vmatmul.msk.f32.gmra.mxu2 %vm566_vm1, %v4633_v17 }
 0x174   :  { %v818_v57 = vpop.f32.mrf.mxu1 }
 0x175   :  { %v4636_v44 = vmax.f32 %v3315_v4, 0.0  ;;  %v982_v11 = vadd.f32 %v818_v57, %v512_v23  ;;  %2354 = vmatmul.msk.f32.gmra.mxu0 %vm96_vm0, %v72_v9 }
 0x177   :  { %v3328_v18 = vadd.f32 %v3029_v39, %v982_v11  ;;  %2402 = vmatmul.msk.f32.gmra.mxu1 %vm566_vm1, %v4636_v44 }
 0x179   :  { %v4635_v52 = vmax.f32 %v3328_v18, 0.0 }
 0x17a   :  { %v399_v17 = vpop.f32.mrf.mxu0 }
 0x17b   :  { %v3338_v6 = vadd.f32 %v2830_v22, %v399_v17  ;;  %2454 = vmatmul.msk.f32.gmra.mxu2 %vm566_vm1, %v4635_v52  ;;  %v74_v52 = vld [vmem:[%s4620_s0 + $0x180] sm:$0xff] }
 0x17c   :  { %v821_v21 = vpop.f32.mrf.mxu1 }
 0x17d   :  { %v4638_v23 = vmax.f32 %v3338_v6, 0.0  ;;  %v983_v11 = vadd.f32 %v821_v21, %v513_v31  ;;  %2355 = vmatmul.msk.f32.gmra.mxu0 %vm96_vm0, %v73_v5 }
 0x17f   :  { %v3348_v9 = vadd.f32 %v3029_v39, %v983_v11  ;;  %2403 = vmatmul.msk.f32.gmra.mxu1 %vm566_vm1, %v4638_v23 }
 0x181   :  { %v4637_v17 = vmax.f32 %v3348_v9, 0.0 }
 0x182   :  { %v402_v57 = vpop.f32.mrf.mxu0 }
 0x183   :  { %v3358_v44 = vadd.f32 %v2830_v22, %v402_v57  ;;  %2455 = vmatmul.msk.f32.gmra.mxu2 %vm566_vm1, %v4637_v17  ;;  %v75_v17 = vld [vmem:[%s4620_s0 + $0x188] sm:$0xff] }
 0x184   :  { %v824_v28 = vpop.f32.mrf.mxu1 }
 0x185   :  { %v4640_v31 = vmax.f32 %v3358_v44, 0.0  ;;  %v984_v5 = vadd.f32 %v824_v28, %v514_v43  ;;  %2356 = vmatmul.msk.f32.gmra.mxu0 %vm96_vm0, %v74_v52  ;;  %v3390_v28 = vld [vmem:[%s4623_s4 + $0x1] ss:$0 sm:$0xff] }
 0x187   :  { %v3368_v21 = vadd.f32 %v3029_v39, %v984_v5  ;;  %2404 = vmatmul.msk.f32.gmra.mxu1 %vm566_vm1, %v4640_v31 }
 0x189   :  { %v4639_v11 = vmax.f32 %v3368_v21, 0.0 }
 0x18a   :  { %v405_v57 = vpop.f32.mrf.mxu0 }
 0x18b   :  { %v3378_v23 = vadd.f32 %v2830_v22, %v405_v57  ;;  %2456 = vmatmul.msk.f32.gmra.mxu2 %vm566_vm1, %v4639_v11 }
 0x18c   :  { %v827_v36 = vpop.f32.mrf.mxu1 }
 0x18d   :  { %v4641_v43 = vmax.f32 %v3378_v23, 0.0  ;;  %v985_v52 = vadd.f32 %v827_v36, %v515_v26  ;;  %2357 = vmatmul.msk.f32.gmra.mxu0 %vm96_vm0, %v75_v17  ;;  %v76_v36 = vld [vmem:[%s4620_s0 + $0x190] sm:$0xff] }
 0x18e   :  { %v1378_v5 = vpop.f32.mrf.mxu2 }
 0x18f   :  { %v3393_v57 = vadd.f32 %v3029_v39, %v985_v52  ;;  %v1570_v11 = vadd.f32 %v1378_v5, %v1100_v48  ;;  %2405 = vmatmul.msk.f32.gmra.mxu1 %vm566_vm1, %v4641_v43 }
 0x191   :  { %v1639_v55 = vadd.f32 %v3390_v28, %v1570_v11  ;;  %v1117_v26 = vmax.f32 %v3393_v57, 0.0 }
 0x192   :  { %v408_v17 = vpop.f32.mrf.mxu0 }
 0x193   :  { %v3406_v31 = vadd.f32 %v2830_v22, %v408_v17  ;;  %2457 = vmatmul.msk.f32.gmra.mxu2 %vm566_vm1, %v1117_v26  ;;  %v1703_v47 = vmax.f32 %v1639_v55, 0.0 }
 0x194   :  { %v830_v48 = vpop.f32.mrf.mxu1 }
 0x195   :  { %v532_v52 = vmax.f32 %v3406_v31, 0.0  ;;  %v986_v11 = vadd.f32 %v830_v48, %v516_v30  ;;  %2358 = vmatmul.msk.f32.gmra.mxu0 %vm96_vm0, %v76_v36  ;;  %2505 = vmatmul.msk.f32.vlgmr.msra.gmra.mxu3 %vm566_vm1, %v1703_v47  ;;  %v77_v36 = vld [vmem:[%s4620_s0 + $0x198] sm:$0xff] }
 0x196   :  { %v1381_v5 = vpop.f32.mrf.mxu2 }
 0x197   :  { %v3417_v43 = vadd.f32 %v3029_v39, %v986_v11  ;;  %v1571_v17 = vadd.f32 %v1381_v5, %v1101_v60  ;;  %2406 = vmatmul.msk.f32.gmra.mxu1 %vm566_vm1, %v532_v52 }
 0x199   :  { %v1640_v55 = vadd.f32 %v3390_v28, %v1571_v17  ;;  %v1118_v3 = vmax.f32 %v3417_v43, 0.0 }
 0x19a   :  { %v411_v30 = vpop.f32.mrf.mxu0 }
 0x19b   :  { %v3430_v47 = vadd.f32 %v2830_v22, %v411_v30  ;;  %2458 = vmatmul.msk.f32.gmra.mxu2 %vm566_vm1, %v1118_v3  ;;  %v1704_v59 = vmax.f32 %v1640_v55, 0.0 }
 0x19c   :  { %v833_v60 = vpop.f32.mrf.mxu1 }
 0x19d   :  { %v533_v48 = vmax.f32 %v3430_v47, 0.0  ;;  %v987_v11 = vadd.f32 %v833_v60, %v517_v34  ;;  %2359 = vmatmul.msk.f32.gmra.mxu0 %vm96_vm0, %v77_v36  ;;  %2506 = vmatmul.msk.f32.gmra.mxu3 %vm566_vm1, %v1704_v59  ;;  %v78_v36 = vld [vmem:[%s4620_s0 + $0x1a0] sm:$0xff] }
 0x19e   :  { %v1384_v5 = vpop.f32.mrf.mxu2 }
 0x19f   :  { %v3441_v17 = vadd.f32 %v3029_v39, %v987_v11  ;;  %v1572_v30 = vadd.f32 %v1384_v5, %v1102_v8  ;;  %2407 = vmatmul.msk.f32.gmra.mxu1 %vm566_vm1, %v533_v48 }
 0x1a1   :  { %v1641_v55 = vadd.f32 %v3390_v28, %v1572_v30  ;;  %v1119_v13 = vmax.f32 %v3441_v17, 0.0 }
 0x1a2   :  { %v414_v34 = vpop.f32.mrf.mxu0 }
 0x1a3   :  { %v3454_v59 = vadd.f32 %v2830_v22, %v414_v34  ;;  %2459 = vmatmul.msk.f32.gmra.mxu2 %vm566_vm1, %v1119_v13  ;;  %v1705_v7 = vmax.f32 %v1641_v55, 0.0 }
 0x1a4   :  { %v836_v8 = vpop.f32.mrf.mxu1 }
 0x1a5   :  { %v534_v60 = vmax.f32 %v3454_v59, 0.0  ;;  %v988_v11 = vadd.f32 %v836_v8, %v518_v38  ;;  %2360 = vmatmul.msk.f32.gmra.mxu0 %vm96_vm0, %v78_v36  ;;  %2507 = vmatmul.msk.f32.gmra.mxu3 %vm566_vm1, %v1705_v7  ;;  %v79_v36 = vld [vmem:[%s4620_s0 + $0x1a8] sm:$0xff] }
 0x1a6   :  { %v1387_v5 = vpop.f32.mrf.mxu2 }
 0x1a7   :  { %v3465_v30 = vadd.f32 %v3029_v39, %v988_v11  ;;  %v1573_v34 = vadd.f32 %v1387_v5, %v1103_v16  ;;  %2408 = vmatmul.msk.f32.gmra.mxu1 %vm566_vm1, %v534_v60 }
 0x1a9   :  { %v1642_v55 = vadd.f32 %v3390_v28, %v1573_v34  ;;  %v1120_v24 = vmax.f32 %v3465_v30, 0.0 }
 0x1aa   :  { %v417_v38 = vpop.f32.mrf.mxu0 }
 0x1ab   :  { %v3478_v7 = vadd.f32 %v2830_v22, %v417_v38  ;;  %2460 = vmatmul.msk.f32.gmra.mxu2 %vm566_vm1, %v1120_v24  ;;  %v1706_v15 = vmax.f32 %v1642_v55, 0.0 }
 0x1ac   :  { %v839_v16 = vpop.f32.mrf.mxu1 }
 0x1ad   :  { %v535_v8 = vmax.f32 %v3478_v7, 0.0  ;;  %v989_v11 = vadd.f32 %v839_v16, %v519_v42  ;;  %2361 = vmatmul.msk.f32.gmra.mxu0 %vm96_vm0, %v79_v36  ;;  %2508 = vmatmul.msk.f32.gmra.mxu3 %vm566_vm1, %v1706_v15  ;;  %v80_v36 = vld [vmem:[%s4620_s0 + $0x1b0] sm:$0xff] }
 0x1ae   :  { %v1390_v5 = vpop.f32.mrf.mxu2 }
 0x1af   :  { %v3489_v34 = vadd.f32 %v3029_v39, %v989_v11  ;;  %v1574_v38 = vadd.f32 %v1390_v5, %v1104_v35  ;;  %2409 = vmatmul.msk.f32.gmra.mxu1 %vm566_vm1, %v535_v8 }
 0x1b1   :  { %v1643_v55 = vadd.f32 %v3390_v28, %v1574_v38  ;;  %v1121_v51 = vmax.f32 %v3489_v34, 0.0 }
 0x1b2   :  { %v420_v42 = vpop.f32.mrf.mxu0 }
 0x1b3   :  { %v3502_v15 = vadd.f32 %v2830_v22, %v420_v42  ;;  %2461 = vmatmul.msk.f32.gmra.mxu2 %vm566_vm1, %v1121_v51  ;;  %v1707_v32 = vmax.f32 %v1643_v55, 0.0 }
 0x1b4   :  { %v842_v35 = vpop.f32.mrf.mxu1 }
 0x1b5   :  { %v536_v16 = vmax.f32 %v3502_v15, 0.0  ;;  %v990_v11 = vadd.f32 %v842_v35, %v520_v46  ;;  %2362 = vmatmul.msk.f32.gmra.mxu0 %vm96_vm0, %v80_v36  ;;  %2509 = vmatmul.msk.f32.gmra.mxu3 %vm566_vm1, %v1707_v32  ;;  %v81_v36 = vld [vmem:[%s4620_s0 + $0x1b8] sm:$0xff] }
 0x1b6   :  { %v1393_v5 = vpop.f32.mrf.mxu2 }
 0x1b7   :  { %v3513_v38 = vadd.f32 %v3029_v39, %v990_v11  ;;  %v1575_v42 = vadd.f32 %v1393_v5, %v1105_v56  ;;  %2410 = vmatmul.msk.f32.gmra.mxu1 %vm566_vm1, %v536_v16 }
 0x1b9   :  { %v1644_v55 = vadd.f32 %v3390_v28, %v1575_v42  ;;  %v1122_v29 = vmax.f32 %v3513_v38, 0.0 }
 0x1ba   :  { %v423_v46 = vpop.f32.mrf.mxu0 }
 0x1bb   :  { %v3526_v32 = vadd.f32 %v2830_v22, %v423_v46  ;;  %2462 = vmatmul.msk.f32.gmra.mxu2 %vm566_vm1, %v1122_v29  ;;  %v1708_v25 = vmax.f32 %v1644_v55, 0.0 }
 0x1bc   :  { %v845_v56 = vpop.f32.mrf.mxu1 }
 0x1bd   :  { %v537_v35 = vmax.f32 %v3526_v32, 0.0  ;;  %v991_v11 = vadd.f32 %v845_v56, %v521_v50  ;;  %2363 = vmatmul.msk.f32.gmra.mxu0 %vm96_vm0, %v81_v36  ;;  %2510 = vmatmul.msk.f32.gmra.mxu3 %vm566_vm1, %v1708_v25  ;;  %v82_v36 = vld [vmem:[%s4620_s0 + $0x1c0] sm:$0xff] }
 0x1be   :  { %v1396_v5 = vpop.f32.mrf.mxu2 }
 0x1bf   :  { %v3537_v42 = vadd.f32 %v3029_v39, %v991_v11  ;;  %v1576_v46 = vadd.f32 %v1396_v5, %v1106_v12  ;;  %2411 = vmatmul.msk.f32.gmra.mxu1 %vm566_vm1, %v537_v35 }
 0x1c1   :  { %v1645_v55 = vadd.f32 %v3390_v28, %v1576_v46  ;;  %v1123_v19 = vmax.f32 %v3537_v42, 0.0 }
 0x1c2   :  { %v426_v50 = vpop.f32.mrf.mxu0 }
 0x1c3   :  { %v3550_v25 = vadd.f32 %v2830_v22, %v426_v50  ;;  %2463 = vmatmul.msk.f32.gmra.mxu2 %vm566_vm1, %v1123_v19  ;;  %v1709_v10 = vmax.f32 %v1645_v55, 0.0 }
 0x1c4   :  { %v848_v12 = vpop.f32.mrf.mxu1 }
 0x1c5   :  { %v538_v56 = vmax.f32 %v3550_v25, 0.0  ;;  %v992_v11 = vadd.f32 %v848_v12, %v522_v54  ;;  %2364 = vmatmul.msk.f32.gmra.mxu0 %vm96_vm0, %v82_v36  ;;  %2511 = vmatmul.msk.f32.gmra.mxu3 %vm566_vm1, %v1709_v10  ;;  %v83_v36 = vld [vmem:[%s4620_s0 + $0x1c8] sm:$0xff] }
 0x1c6   :  { %v1399_v5 = vpop.f32.mrf.mxu2 }
 0x1c7   :  { %v3561_v46 = vadd.f32 %v3029_v39, %v992_v11  ;;  %v1577_v50 = vadd.f32 %v1399_v5, %v1107_v27  ;;  %2412 = vmatmul.msk.f32.gmra.mxu1 %vm566_vm1, %v538_v56 }
 0x1c9   :  { %v4642_v55 = vmax.f32 %v3561_v46, 0.0  ;;  %v1646_v41 = vadd.f32 %v3390_v28, %v1577_v50 }
 0x1ca   :  { %v429_v54 = vpop.f32.mrf.mxu0 }
 0x1cb   :  { %v3574_v10 = vadd.f32 %v2830_v22, %v429_v54  ;;  %2464 = vmatmul.msk.f32.gmra.mxu2 %vm566_vm1, %v4642_v55  ;;  %v1710_v37 = vmax.f32 %v1646_v41, 0.0 }
 0x1cc   :  { %v851_v27 = vpop.f32.mrf.mxu1 }
 0x1cd   :  { %v539_v12 = vmax.f32 %v3574_v10, 0.0  ;;  %v993_v11 = vadd.f32 %v851_v27, %v523_v58  ;;  %2365 = vmatmul.msk.f32.gmra.mxu0 %vm96_vm0, %v83_v36  ;;  %2512 = vmatmul.msk.f32.gmra.mxu3 %vm566_vm1, %v1710_v37  ;;  %v84_v36 = vld [vmem:[%s4620_s0 + $0x1d0] sm:$0xff] }
 0x1ce   :  { %v1402_v5 = vpop.f32.mrf.mxu2 }
 0x1cf   :  { %v3585_v50 = vadd.f32 %v3029_v39, %v993_v11  ;;  %v1578_v54 = vadd.f32 %v1402_v5, %v1108_v0  ;;  %2413 = vmatmul.msk.f32.gmra.mxu1 %vm566_vm1, %v539_v12 }
 0x1d1   :  { %v4643_v41 = vmax.f32 %v3585_v50, 0.0  ;;  %v1647_v33 = vadd.f32 %v3390_v28, %v1578_v54 }
 0x1d2   :  { %v432_v58 = vpop.f32.mrf.mxu0 }
 0x1d3   :  { %v3598_v37 = vadd.f32 %v2830_v22, %v432_v58  ;;  %2465 = vmatmul.msk.f32.gmra.mxu2 %vm566_vm1, %v4643_v41  ;;  %v1711_v63 = vmax.f32 %v1647_v33, 0.0  ;;  %v4673_v58 = vmax.f32 %v3216_v49, 0.0 }
 0x1d4   :  { %v854_v0 = vpop.f32.mrf.mxu1 }
 0x1d5   :  { %v4644_v27 = vmax.f32 %v3598_v37, 0.0  ;;  %v994_v11 = vadd.f32 %v854_v0, %v524_v62  ;;  %2366 = vmatmul.msk.f32.gmra.mxu0 %vm96_vm0, %v84_v36  ;;  %2513 = vmatmul.msk.f32.gmra.mxu3 %vm566_vm1, %v1711_v63  ;;  %v85_v36 = vld [vmem:[%s4620_s0 + $0x1d8] sm:$0xff] }
 0x1d6   :  { %v1405_v5 = vpop.f32.mrf.mxu2 }
 0x1d7   :  { %v3609_v54 = vadd.f32 %v3029_v39, %v994_v11  ;;  %v1579_v55 = vadd.f32 %v1405_v5, %v4673_v58  ;;  %2414 = vmatmul.msk.f32.gmra.mxu1 %vm566_vm1, %v4644_v27  ;;  %v4674_v5 = vmax.f32 %v3246_v40, 0.0 }
 0x1d9   :  { %v4645_v33 = vmax.f32 %v3609_v54, 0.0  ;;  %v1648_v53 = vadd.f32 %v3390_v28, %v1579_v55 }
 0x1da   :  { %v435_v62 = vpop.f32.mrf.mxu0 }
 0x1db   :  { %v3622_v63 = vadd.f32 %v2830_v22, %v435_v62  ;;  %2466 = vmatmul.msk.f32.gmra.mxu2 %vm566_vm1, %v4645_v33  ;;  %v1712_v49 = vmax.f32 %v1648_v53, 0.0  ;;  %v4675_v62 = vmax.f32 %v3236_v45, 0.0 }
 0x1dc   :  { %v857_v0 = vpop.f32.mrf.mxu1 }
 0x1dd   :  { %v4646_v11 = vmax.f32 %v3622_v63, 0.0  ;;  %v995_v58 = vadd.f32 %v857_v0, %v4674_v5  ;;  %2367 = vmatmul.msk.f32.gmra.mxu0 %vm96_vm0, %v85_v36  ;;  %2514 = vmatmul.msk.f32.gmra.mxu3 %vm566_vm1, %v1712_v49  ;;  %v86_v36 = vld [vmem:[%s4620_s0 + $0x1e0] sm:$0xff] }
 0x1de   :  { %v1408_v55 = vpop.f32.mrf.mxu2 }
 0x1df   :  { %v3633_v41 = vadd.f32 %v3029_v39, %v995_v58  ;;  %v1580_v27 = vadd.f32 %v1408_v55, %v4675_v62  ;;  %2415 = vmatmul.msk.f32.gmra.mxu1 %vm566_vm1, %v4646_v11  ;;  %v4676_v55 = vmax.f32 %v3266_v20, 0.0 }
 0x1e1   :  { %v4647_v53 = vmax.f32 %v3633_v41, 0.0  ;;  %v1649_v40 = vadd.f32 %v3390_v28, %v1580_v27 }
 0x1e2   :  { %v438_v0 = vpop.f32.mrf.mxu0 }
 0x1e3   :  { %v3646_v49 = vadd.f32 %v2830_v22, %v438_v0  ;;  %2467 = vmatmul.msk.f32.gmra.mxu2 %vm566_vm1, %v4647_v53  ;;  %v1713_v45 = vmax.f32 %v1649_v40, 0.0  ;;  %v4677_v0 = vmax.f32 %v3256_v61, 0.0 }
 0x1e4   :  { %v860_v5 = vpop.f32.mrf.mxu1 }
 0x1e5   :  { %v4650_v58 = vmax.f32 %v3646_v49, 0.0  ;;  %v996_v62 = vadd.f32 %v860_v5, %v4676_v55  ;;  %2368 = vmatmul.msk.f32.gmra.mxu0 %vm96_vm0, %v86_v36  ;;  %2515 = vmatmul.msk.f32.gmra.mxu3 %vm566_vm1, %v1713_v45  ;;  %v87_v36 = vld [vmem:[%s4620_s0 + $0x1e8] sm:$0xff] }
 0x1e6   :  { %v1411_v27 = vpop.f32.mrf.mxu2 }
 0x1e7   :  { %v3657_v33 = vadd.f32 %v3029_v39, %v996_v62  ;;  %v1581_v11 = vadd.f32 %v1411_v27, %v4677_v0  ;;  %2416 = vmatmul.msk.f32.gmra.mxu1 %vm566_vm1, %v4650_v58  ;;  %v4678_v27 = vmax.f32 %v3286_v2, 0.0 }
 0x1e9   :  { %v4648_v40 = vmax.f32 %v3657_v33, 0.0  ;;  %v1650_v20 = vadd.f32 %v3390_v28, %v1581_v11 }
 0x1ea   :  { %v441_v5 = vpop.f32.mrf.mxu0 }
 0x1eb   :  { %v3670_v45 = vadd.f32 %v2830_v22, %v441_v5  ;;  %2468 = vmatmul.msk.f32.gmra.mxu2 %vm566_vm1, %v4648_v40  ;;  %v1714_v61 = vmax.f32 %v1650_v20, 0.0  ;;  %v4679_v22 = vmax.f32 %v3276_v1, 0.0 }
 0x1ec   :  { %v863_v55 = vpop.f32.mrf.mxu1 }
 0x1ed   :  { %v4649_v62 = vmax.f32 %v3670_v45, 0.0  ;;  %v997_v0 = vadd.f32 %v863_v55, %v4678_v27  ;;  %2369 = vmatmul.msk.f32.gmra.mxu0 %vm96_vm0, %v87_v36  ;;  %2516 = vmatmul.msk.f32.gmra.mxu3 %vm566_vm1, %v1714_v61  ;;  %v88_v36 = vld [vmem:[%s4620_s0 + $0x1f0] sm:$0xff]  ;;  %v3696_v61 = vld [vmem:[%s4621_s2] ss:$0 sm:$0xff] }
 0x1ee   :  { %v1414_v11 = vpop.f32.mrf.mxu2 }
 0x1ef   :  { %v3681_v53 = vadd.f32 %v3029_v39, %v997_v0  ;;  %v1582_v5 = vadd.f32 %v1414_v11, %v4679_v22  ;;  %2417 = vmatmul.msk.f32.gmra.mxu1 %vm566_vm1, %v4649_v62  ;;  %v4680_v22 = vmax.f32 %v3315_v4, 0.0 }
 0x1f1   :  { %v4651_v20 = vmax.f32 %v3681_v53, 0.0  ;;  %v1651_v2 = vadd.f32 %v3390_v28, %v1582_v5 }
 0x1f2   :  { %v444_v55 = vpop.f32.mrf.mxu0 }
 0x1f3   :  { %v3699_v1 = vadd.f32 %v3696_v61, %v444_v55  ;;  %2469 = vmatmul.msk.f32.gmra.mxu2 %vm566_vm1, %v4651_v20  ;;  %v1715_v27 = vmax.f32 %v1651_v2, 0.0  ;;  %v4681_v55 = vmax.f32 %v3299_v14, 0.0 }
 0x1f4   :  { %v866_v0 = vpop.f32.mrf.mxu1 }
 0x1f5   :  { %v4652_v11 = vmax.f32 %v3699_v1, 0.0  ;;  %v998_v5 = vadd.f32 %v866_v0, %v4680_v22  ;;  %2370 = vmatmul.msk.f32.gmra.mxu0 %vm96_vm0, %v88_v36  ;;  %2517 = vmatmul.msk.f32.gmra.mxu3 %vm566_vm1, %v1715_v27  ;;  %v89_v36 = vld [vmem:[%s4620_s0 + $0x1f8] sm:$0xff] }
 0x1f6   :  { %v1417_v40 = vpop.f32.mrf.mxu2 }
 0x1f7   :  { %v3710_v62 = vadd.f32 %v3029_v39, %v998_v5  ;;  %v1583_v58 = vadd.f32 %v1417_v40, %v4681_v55  ;;  %2418 = vmatmul.msk.f32.gmra.mxu1 %vm566_vm1, %v4652_v11  ;;  %v4682_v5 = vmax.f32 %v3338_v6, 0.0 }
 0x1f9   :  { %v4653_v2 = vmax.f32 %v3710_v62, 0.0  ;;  %v1652_v4 = vadd.f32 %v3390_v28, %v1583_v58 }
 0x1fa   :  { %v447_v0 = vpop.f32.mrf.mxu0 }
 0x1fb   :  { %v3723_v27 = vadd.f32 %v3696_v61, %v447_v0  ;;  %2470 = vmatmul.msk.f32.gmra.mxu2 %vm566_vm1, %v4653_v2  ;;  %v1716_v14 = vmax.f32 %v1652_v4, 0.0  ;;  %v4683_v0 = vmax.f32 %v3328_v18, 0.0 }
 0x1fc   :  { %v869_v40 = vpop.f32.mrf.mxu1 }
 0x1fd   :  { %v4655_v22 = vmax.f32 %v3723_v27, 0.0  ;;  %v999_v55 = vadd.f32 %v869_v40, %v4682_v5  ;;  %2371 = vmatmul.msk.f32.gmra.mxu0 %vm96_vm0, %v89_v36  ;;  %2518 = vmatmul.msk.f32.gmra.mxu3 %vm566_vm1, %v1716_v14 }
 0x1fe   :  { %v1420_v58 = vpop.f32.mrf.mxu2 }
 0x1ff   :  { %v3734_v20 = vadd.f32 %v3029_v39, %v999_v55  ;;  %v1584_v11 = vadd.f32 %v1420_v58, %v4683_v0  ;;  %2419 = vmatmul.msk.f32.gmra.mxu1 %vm566_vm1, %v4655_v22  ;;  %v4684_v55 = vmax.f32 %v3358_v44, 0.0 }
 0x201   :  { %v4654_v4 = vmax.f32 %v3734_v20, 0.0  ;;  %v1653_v6 = vadd.f32 %v3390_v28, %v1584_v11 }
 0x202   :  { %v450_v40 = vpop.f32.mrf.mxu0 }
 0x203   :  { %v3744_v36 = vadd.f32 %v3696_v61, %v450_v40  ;;  %2471 = vmatmul.msk.f32.gmra.mxu2 %vm566_vm1, %v4654_v4  ;;  %v1717_v14 = vmax.f32 %v1653_v6, 0.0  ;;  %v4685_v40 = vmax.f32 %v3348_v9, 0.0 }
 0x204   :  { %v872_v5 = vpop.f32.mrf.mxu1 }
 0x205   :  { %v4657_v18 = vmax.f32 %v3744_v36, 0.0  ;;  %v1000_v58 = vadd.f32 %v872_v5, %v4684_v55  ;;  %2519 = vmatmul.msk.f32.gmra.mxu3 %vm566_vm1, %v1717_v14  ;;  %v4686_v55 = vmax.f32 %v3378_v23, 0.0 }
 0x206   :  { %v1423_v0 = vpop.f32.mrf.mxu2 }
 0x207   :  { %v3754_v11 = vadd.f32 %v3029_v39, %v1000_v58  ;;  %v1585_v2 = vadd.f32 %v1423_v0, %v4685_v40  ;;  %2420 = vmatmul.msk.f32.gmra.mxu1 %vm566_vm1, %v4657_v18 }
 0x209   :  { %v4656_v6 = vmax.f32 %v3754_v11, 0.0  ;;  %v1654_v4 = vadd.f32 %v3390_v28, %v1585_v2 }
 0x20a   :  { %v453_v22 = vpop.f32.mrf.mxu0 }
 0x20b   :  { %v3764_v44 = vadd.f32 %v3696_v61, %v453_v22  ;;  %2472 = vmatmul.msk.f32.gmra.mxu2 %vm566_vm1, %v4656_v6  ;;  %v1718_v14 = vmax.f32 %v1654_v4, 0.0  ;;  %v4687_v22 = vmax.f32 %v3368_v21, 0.0 }
 0x20c   :  { %v875_v5 = vpop.f32.mrf.mxu1 }
 0x20d   :  { %v547_v9 = vmax.f32 %v3764_v44, 0.0  ;;  %v1001_v58 = vadd.f32 %v875_v5, %v4686_v55  ;;  %2520 = vmatmul.msk.f32.gmra.mxu3 %vm566_vm1, %v1718_v14 }
 0x20e   :  { %v1426_v0 = vpop.f32.mrf.mxu2 }
 0x20f   :  { %v3774_v2 = vadd.f32 %v3029_v39, %v1001_v58  ;;  %v1586_v40 = vadd.f32 %v1426_v0, %v4687_v22  ;;  %2421 = vmatmul.msk.f32.gmra.mxu1 %vm566_vm1, %v547_v9  ;;  %v3796_v58 = vld [vmem:[%s4625_s6] ss:$0 sm:$0xff] }
 0x211   :  { %v1133_v4 = vmax.f32 %v3774_v2, 0.0  ;;  %v1655_v6 = vadd.f32 %v3390_v28, %v1586_v40 }
 0x212   :  { %v456_v18 = vpop.f32.mrf.mxu0 }
 0x213   :  { %v3784_v23 = vadd.f32 %v3696_v61, %v456_v18  ;;  %2473 = vmatmul.msk.f32.gmra.mxu2 %vm566_vm1, %v1133_v4  ;;  %v1719_v14 = vmax.f32 %v1655_v6, 0.0 }
 0x214   :  { %v878_v5 = vpop.f32.mrf.mxu1 }
 0x215   :  { %v548_v21 = vmax.f32 %v3784_v23, 0.0  ;;  %v1002_v55 = vadd.f32 %v878_v5, %v532_v52  ;;  %2521 = vmatmul.msk.f32.gmra.mxu3 %vm566_vm1, %v1719_v14 }
 0x216   :  { %v1429_v18 = vpop.f32.mrf.mxu2 }
 0x217   :  { %v3799_v0 = vadd.f32 %v3029_v39, %v1002_v55  ;;  %v1587_v6 = vadd.f32 %v1429_v18, %v1117_v26  ;;  %2422 = vmatmul.msk.f32.gmra.mxu1 %vm566_vm1, %v548_v21 }
 0x218   :  { %v1984_v31 = vpop.f32.mrf.mxu3 }
 0x219   :  { %v4658_v52 = vmax.f32 %v3799_v0, 0.0  ;;  %v1656_v22 = vadd.f32 %v3390_v28, %v1587_v6  ;;  %v1985_v40 = vadd.f32 %v3796_v58, %v1984_v31 }
 0x21a   :  { %v459_v14 = vpop.f32.mrf.mxu0 }
 0x21b   :  { %2573 = vtanh.f32 %v1985_v40  ;;  %v3810_v5 = vadd.f32 %v3696_v61, %v459_v14  ;;  %2474 = vmatmul.msk.f32.gmra.mxu2 %vm566_vm1, %v4658_v52  ;;  %v1720_v57 = vmax.f32 %v1656_v22, 0.0 }
 0x21c   :  { %v881_v26 = vpop.f32.mrf.mxu1 }
 0x21d   :  { %v549_v55 = vmax.f32 %v3810_v5, 0.0  ;;  %v1003_v18 = vadd.f32 %v881_v26, %v533_v48  ;;  %2522 = vmatmul.msk.f32.gmra.mxu3 %vm566_vm1, %v1720_v57 }
 0x21e   :  { %v1432_v6 = vpop.f32.mrf.mxu2 }
 0x21f   :  { %v3820_v31 = vadd.f32 %v3029_v39, %v1003_v18  ;;  %v1588_v40 = vadd.f32 %v1432_v6, %v1118_v3  ;;  %2423 = vmatmul.msk.f32.gmra.mxu1 %vm566_vm1, %v549_v55 }
 0x220   :  { %v1987_v22 = vpop.f32.mrf.mxu3 }
 0x221   :  { %v2574_v14 = vpop.eup %2573  ;;  %v1135_v52 = vmax.f32 %v3820_v31, 0.0  ;;  %v1657_v47 = vadd.f32 %v3390_v28, %v1588_v40  ;;  %v1988_v48 = vadd.f32 %v3796_v58, %v1987_v22 }
 0x222   :  { %2240 = vst [vmem:[%s4626_s7] sm:$0xff] %v2574_v14  ;;  %v462_v57 = vpop.f32.mrf.mxu0 }
 0x223   :  { %2575 = vtanh.f32 %v1988_v48  ;;  %v3834_v43 = vadd.f32 %v3696_v61, %v462_v57  ;;  %2475 = vmatmul.msk.f32.gmra.mxu2 %vm566_vm1, %v1135_v52  ;;  %v1721_v3 = vmax.f32 %v1657_v47, 0.0 }
 0x224   :  { %v884_v26 = vpop.f32.mrf.mxu1 }
 0x225   :  { %v550_v18 = vmax.f32 %v3834_v43, 0.0  ;;  %v1004_v6 = vadd.f32 %v884_v26, %v534_v60  ;;  %2523 = vmatmul.msk.f32.gmra.mxu3 %vm566_vm1, %v1721_v3 }
 0x226   :  { %v1435_v40 = vpop.f32.mrf.mxu2 }
 0x227   :  { %v3844_v22 = vadd.f32 %v3029_v39, %v1004_v6  ;;  %v1589_v14 = vadd.f32 %v1435_v40, %v1119_v13  ;;  %2424 = vmatmul.msk.f32.gmra.mxu1 %vm566_vm1, %v550_v18 }
 0x228   :  { %v1990_v47 = vpop.f32.mrf.mxu3 }
 0x229   :  { %v2576_v48 = vpop.eup %2575  ;;  %v1136_v57 = vmax.f32 %v3844_v22, 0.0  ;;  %v1658_v59 = vadd.f32 %v3390_v28, %v1589_v14  ;;  %v1991_v60 = vadd.f32 %v3796_v58, %v1990_v47  ;;  %v3870_v14 = vld [vmem:[%s4623_s4] ss:$0 sm:$0xff] }
 0x22a   :  { %2241 = vst [vmem:[%s4626_s7 + $0x8] sm:$0xff] %v2576_v48  ;;  %v465_v39 = vpop.f32.mrf.mxu0 }
 0x22b   :  { %2577 = vtanh.f32 %v1991_v60  ;;  %v3858_v17 = vadd.f32 %v3696_v61, %v465_v39  ;;  %2476 = vmatmul.msk.f32.gmra.mxu2 %vm566_vm1, %v1136_v57  ;;  %v1722_v13 = vmax.f32 %v1658_v59, 0.0 }
 0x22c   :  { %v887_v3 = vpop.f32.mrf.mxu1 }
 0x22d   :  { %v551_v26 = vmax.f32 %v3858_v17, 0.0  ;;  %v1005_v6 = vadd.f32 %v887_v3, %v535_v8  ;;  %2524 = vmatmul.msk.f32.gmra.mxu3 %vm566_vm1, %v1722_v13 }
 0x22e   :  { %v1438_v40 = vpop.f32.mrf.mxu2 }
 0x22f   :  { %v3873_v47 = vadd.f32 %v3870_v14, %v1005_v6  ;;  %v1590_v48 = vadd.f32 %v1438_v40, %v1120_v24  ;;  %2425 = vmatmul.msk.f32.gmra.mxu1 %vm566_vm1, %v551_v26 }
 0x230   :  { %v1993_v7 = vpop.f32.mrf.mxu3 }
 0x231   :  { %v2578_v8 = vpop.eup %2577  ;;  %v1137_v59 = vmax.f32 %v3873_v47, 0.0  ;;  %v1659_v60 = vadd.f32 %v3390_v28, %v1590_v48  ;;  %v1994_v39 = vadd.f32 %v3796_v58, %v1993_v7 }
 0x232   :  { %2242 = vst [vmem:[%s4626_s7 + $0x10] sm:$0xff] %v2578_v8  ;;  %v468_v13 = vpop.f32.mrf.mxu0 }
 0x233   :  { %2579 = vtanh.f32 %v1994_v39  ;;  %v3887_v30 = vadd.f32 %v3696_v61, %v468_v13  ;;  %2477 = vmatmul.msk.f32.gmra.mxu2 %vm566_vm1, %v1137_v59  ;;  %v1723_v24 = vmax.f32 %v1659_v60, 0.0 }
 0x234   :  { %v890_v3 = vpop.f32.mrf.mxu1 }
 0x235   :  { %v552_v6 = vmax.f32 %v3887_v30, 0.0  ;;  %v1006_v40 = vadd.f32 %v890_v3, %v536_v16  ;;  %2525 = vmatmul.msk.f32.gmra.mxu3 %vm566_vm1, %v1723_v24 }
 0x236   :  { %v1441_v48 = vpop.f32.mrf.mxu2 }
 0x237   :  { %v3897_v7 = vadd.f32 %v3870_v14, %v1006_v40  ;;  %v1591_v8 = vadd.f32 %v1441_v48, %v1121_v51  ;;  %2426 = vmatmul.msk.f32.gmra.mxu1 %vm566_vm1, %v552_v6 }
 0x238   :  { %v1996_v60 = vpop.f32.mrf.mxu3 }
 0x239   :  { %v2580_v39 = vpop.eup %2579  ;;  %v1138_v13 = vmax.f32 %v3897_v7, 0.0  ;;  %v1660_v15 = vadd.f32 %v3390_v28, %v1591_v8  ;;  %v1997_v16 = vadd.f32 %v3796_v58, %v1996_v60 }
 0x23a   :  { %2243 = vst [vmem:[%s4626_s7 + $0x18] sm:$0xff] %v2580_v39  ;;  %v471_v24 = vpop.f32.mrf.mxu0 }
 0x23b   :  { %2581 = vtanh.f32 %v1997_v16  ;;  %v3911_v34 = vadd.f32 %v3696_v61, %v471_v24  ;;  %2478 = vmatmul.msk.f32.gmra.mxu2 %vm566_vm1, %v1138_v13  ;;  %v1724_v51 = vmax.f32 %v1660_v15, 0.0 }
 0x23c   :  { %v893_v3 = vpop.f32.mrf.mxu1 }
 0x23d   :  { %v553_v40 = vmax.f32 %v3911_v34, 0.0  ;;  %v1007_v48 = vadd.f32 %v893_v3, %v537_v35  ;;  %2526 = vmatmul.msk.f32.gmra.mxu3 %vm566_vm1, %v1724_v51 }
 0x23e   :  { %v1444_v8 = vpop.f32.mrf.mxu2 }
 0x23f   :  { %v3921_v60 = vadd.f32 %v3870_v14, %v1007_v48  ;;  %v1592_v39 = vadd.f32 %v1444_v8, %v1122_v29  ;;  %2427 = vmatmul.msk.f32.gmra.mxu1 %vm566_vm1, %v553_v40 }
 0x240   :  { %v1999_v15 = vpop.f32.mrf.mxu3 }
 0x241   :  { %v2582_v16 = vpop.eup %2581  ;;  %v1139_v24 = vmax.f32 %v3921_v60, 0.0  ;;  %v1661_v32 = vadd.f32 %v3390_v28, %v1592_v39  ;;  %v2000_v35 = vadd.f32 %v3796_v58, %v1999_v15 }
 0x242   :  { %2244 = vst [vmem:[%s4626_s7 + $0x20] sm:$0xff] %v2582_v16  ;;  %v474_v51 = vpop.f32.mrf.mxu0 }
 0x243   :  { %2583 = vtanh.f32 %v2000_v35  ;;  %v3935_v38 = vadd.f32 %v3696_v61, %v474_v51  ;;  %2479 = vmatmul.msk.f32.gmra.mxu2 %vm566_vm1, %v1139_v24  ;;  %v1725_v29 = vmax.f32 %v1661_v32, 0.0 }
 0x244   :  { %v896_v3 = vpop.f32.mrf.mxu1 }
 0x245   :  { %v554_v48 = vmax.f32 %v3935_v38, 0.0  ;;  %v1008_v8 = vadd.f32 %v896_v3, %v538_v56  ;;  %2527 = vmatmul.msk.f32.gmra.mxu3 %vm566_vm1, %v1725_v29 }
 0x246   :  { %v1447_v39 = vpop.f32.mrf.mxu2 }
 0x247   :  { %v3945_v15 = vadd.f32 %v3870_v14, %v1008_v8  ;;  %v1593_v16 = vadd.f32 %v1447_v39, %v1123_v19  ;;  %2428 = vmatmul.msk.f32.gmra.mxu1 %vm566_vm1, %v554_v48 }
 0x248   :  { %v2002_v32 = vpop.f32.mrf.mxu3 }
 0x249   :  { %v2584_v35 = vpop.eup %2583  ;;  %v4659_v51 = vmax.f32 %v3945_v15, 0.0  ;;  %v1662_v25 = vadd.f32 %v3390_v28, %v1593_v16  ;;  %v2003_v56 = vadd.f32 %v3796_v58, %v2002_v32 }
 0x24a   :  { %2245 = vst [vmem:[%s4626_s7 + $0x28] sm:$0xff] %v2584_v35  ;;  %v477_v29 = vpop.f32.mrf.mxu0  ;;  %v4688_v35 = vmax.f32 %v3561_v46, 0.0 }
 0x24b   :  { %2585 = vtanh.f32 %v2003_v56  ;;  %v3959_v42 = vadd.f32 %v3696_v61, %v477_v29  ;;  %2480 = vmatmul.msk.f32.gmra.mxu2 %vm566_vm1, %v4659_v51  ;;  %v1726_v19 = vmax.f32 %v1662_v25, 0.0 }
 0x24c   :  { %v899_v3 = vpop.f32.mrf.mxu1 }
 0x24d   :  { %v4661_v8 = vmax.f32 %v3959_v42, 0.0  ;;  %v1009_v39 = vadd.f32 %v899_v3, %v539_v12  ;;  %2528 = vmatmul.msk.f32.gmra.mxu3 %vm566_vm1, %v1726_v19 }
 0x24e   :  { %v1450_v16 = vpop.f32.mrf.mxu2 }
 0x24f   :  { %v3969_v32 = vadd.f32 %v3870_v14, %v1009_v39  ;;  %v1594_v56 = vadd.f32 %v1450_v16, %v4688_v35  ;;  %2429 = vmatmul.msk.f32.gmra.mxu1 %vm566_vm1, %v4661_v8  ;;  %v4689_v35 = vmax.f32 %v3598_v37, 0.0 }
 0x250   :  { %v2005_v25 = vpop.f32.mrf.mxu3 }
 0x251   :  { %v2586_v29 = vpop.eup %2585  ;;  %v4660_v51 = vmax.f32 %v3969_v32, 0.0  ;;  %v1663_v10 = vadd.f32 %v3390_v28, %v1594_v56  ;;  %v2006_v12 = vadd.f32 %v3796_v58, %v2005_v25 }
 0x252   :  { %2246 = vst [vmem:[%s4626_s7 + $0x30] sm:$0xff] %v2586_v29  ;;  %v480_v19 = vpop.f32.mrf.mxu0 }
 0x253   :  { %v1727_v3 = vmax.f32 %v1663_v10, 0.0  ;;  %2587 = vtanh.f32 %v2006_v12  ;;  %v3983_v46 = vadd.f32 %v3696_v61, %v480_v19  ;;  %2481 = vmatmul.msk.f32.gmra.mxu2 %vm566_vm1, %v4660_v51  ;;  %v4690_v10 = vmax.f32 %v3585_v50, 0.0 }
 0x254   :  { %v902_v39 = vpop.f32.mrf.mxu1 }
 0x255   :  { %v4663_v16 = vmax.f32 %v3983_v46, 0.0  ;;  %v1010_v56 = vadd.f32 %v902_v39, %v4689_v35  ;;  %2529 = vmatmul.msk.f32.gmra.mxu3 %vm566_vm1, %v1727_v3 }
 0x256   :  { %v1453_v25 = vpop.f32.mrf.mxu2 }
 0x257   :  { %v3993_v29 = vadd.f32 %v3870_v14, %v1010_v56  ;;  %v1595_v12 = vadd.f32 %v1453_v25, %v4690_v10  ;;  %2430 = vmatmul.msk.f32.gmra.mxu1 %vm566_vm1, %v4663_v16  ;;  %v4691_v10 = vmax.f32 %v3622_v63, 0.0 }
 0x258   :  { %v2008_v19 = vpop.f32.mrf.mxu3 }
 0x259   :  { %v2588_v51 = vpop.eup %2587  ;;  %v4662_v8 = vmax.f32 %v3993_v29, 0.0  ;;  %v1664_v37 = vadd.f32 %v3390_v28, %v1595_v12  ;;  %v2009_v39 = vadd.f32 %v3796_v58, %v2008_v19 }
 0x25a   :  { %2247 = vst [vmem:[%s4626_s7 + $0x38] sm:$0xff] %v2588_v51  ;;  %v483_v3 = vpop.f32.mrf.mxu0 }
 0x25b   :  { %v1728_v35 = vmax.f32 %v1664_v37, 0.0  ;;  %2589 = vtanh.f32 %v2009_v39  ;;  %v4007_v50 = vadd.f32 %v3696_v61, %v483_v3  ;;  %2482 = vmatmul.msk.f32.gmra.mxu2 %vm566_vm1, %v4662_v8  ;;  %v4692_v37 = vmax.f32 %v3609_v54, 0.0 }
 0x25c   :  { %v905_v56 = vpop.f32.mrf.mxu1 }
 0x25d   :  { %v4665_v25 = vmax.f32 %v4007_v50, 0.0  ;;  %v1011_v12 = vadd.f32 %v905_v56, %v4691_v10  ;;  %2530 = vmatmul.msk.f32.gmra.mxu3 %vm566_vm1, %v1728_v35 }
 0x25e   :  { %v1456_v19 = vpop.f32.mrf.mxu2 }
 0x25f   :  { %v4017_v51 = vadd.f32 %v3870_v14, %v1011_v12  ;;  %v1596_v39 = vadd.f32 %v1456_v19, %v4692_v37  ;;  %2431 = vmatmul.msk.f32.gmra.mxu1 %vm566_vm1, %v4665_v25  ;;  %v4693_v37 = vmax.f32 %v3646_v49, 0.0 }
 0x260   :  { %v2011_v3 = vpop.f32.mrf.mxu3 }
 0x261   :  { %v2590_v8 = vpop.eup %2589  ;;  %v4664_v16 = vmax.f32 %v4017_v51, 0.0  ;;  %v1665_v63 = vadd.f32 %v3390_v28, %v1596_v39  ;;  %v2012_v56 = vadd.f32 %v3796_v58, %v2011_v3 }
 0x262   :  { %2248 = vst [vmem:[%s4626_s7 + $0x40] sm:$0xff] %v2590_v8  ;;  %v486_v35 = vpop.f32.mrf.mxu0 }
 0x263   :  { %v1729_v10 = vmax.f32 %v1665_v63, 0.0  ;;  %2591 = vtanh.f32 %v2012_v56  ;;  %v4031_v54 = vadd.f32 %v3696_v61, %v486_v35  ;;  %2483 = vmatmul.msk.f32.gmra.mxu2 %vm566_vm1, %v4664_v16  ;;  %v4694_v63 = vmax.f32 %v3633_v41, 0.0 }
 0x264   :  { %v908_v12 = vpop.f32.mrf.mxu1 }
 0x265   :  { %v4667_v19 = vmax.f32 %v4031_v54, 0.0  ;;  %v1012_v39 = vadd.f32 %v908_v12, %v4693_v37  ;;  %2531 = vmatmul.msk.f32.gmra.mxu3 %vm566_vm1, %v1729_v10 }
 0x266   :  { %v1459_v3 = vpop.f32.mrf.mxu2 }
 0x267   :  { %v4041_v8 = vadd.f32 %v3870_v14, %v1012_v39  ;;  %v1597_v56 = vadd.f32 %v1459_v3, %v4694_v63  ;;  %2432 = vmatmul.msk.f32.gmra.mxu1 %vm566_vm1, %v4667_v19  ;;  %v4695_v63 = vmax.f32 %v3670_v45, 0.0 }
 0x268   :  { %v2014_v35 = vpop.f32.mrf.mxu3 }
 0x269   :  { %v2592_v16 = vpop.eup %2591  ;;  %v4666_v25 = vmax.f32 %v4041_v8, 0.0  ;;  %v1666_v49 = vadd.f32 %v3390_v28, %v1597_v56  ;;  %v2015_v12 = vadd.f32 %v3796_v58, %v2014_v35 }
 0x26a   :  { %2249 = vst [vmem:[%s4626_s7 + $0x48] sm:$0xff] %v2592_v16  ;;  %v489_v10 = vpop.f32.mrf.mxu0 }
 0x26b   :  { %v1730_v37 = vmax.f32 %v1666_v49, 0.0  ;;  %2593 = vtanh.f32 %v2015_v12  ;;  %v4055_v41 = vadd.f32 %v3696_v61, %v489_v10  ;;  %2484 = vmatmul.msk.f32.gmra.mxu2 %vm566_vm1, %v4666_v25  ;;  %v4696_v49 = vmax.f32 %v3657_v33, 0.0 }
 0x26c   :  { %v911_v39 = vpop.f32.mrf.mxu1 }
 0x26d   :  { %v4669_v3 = vmax.f32 %v4055_v41, 0.0  ;;  %v1013_v56 = vadd.f32 %v911_v39, %v4695_v63  ;;  %2532 = vmatmul.msk.f32.gmra.mxu3 %vm566_vm1, %v1730_v37 }
 0x26e   :  { %v1462_v35 = vpop.f32.mrf.mxu2 }
 0x26f   :  { %v4065_v16 = vadd.f32 %v3870_v14, %v1013_v56  ;;  %v1598_v12 = vadd.f32 %v1462_v35, %v4696_v49  ;;  %2433 = vmatmul.msk.f32.gmra.mxu1 %vm566_vm1, %v4669_v3  ;;  %v4697_v49 = vmax.f32 %v3699_v1, 0.0 }
 0x270   :  { %v2017_v10 = vpop.f32.mrf.mxu3 }
 0x271   :  { %v2594_v25 = vpop.eup %2593  ;;  %v4668_v19 = vmax.f32 %v4065_v16, 0.0  ;;  %v1667_v45 = vadd.f32 %v3390_v28, %v1598_v12  ;;  %v2018_v39 = vadd.f32 %v3796_v58, %v2017_v10 }
 0x272   :  { %2250 = vst [vmem:[%s4626_s7 + $0x50] sm:$0xff] %v2594_v25  ;;  %v492_v37 = vpop.f32.mrf.mxu0 }
 0x273   :  { %v1731_v63 = vmax.f32 %v1667_v45, 0.0  ;;  %2595 = vtanh.f32 %v2018_v39  ;;  %v4079_v33 = vadd.f32 %v3696_v61, %v492_v37  ;;  %2485 = vmatmul.msk.f32.gmra.mxu2 %vm566_vm1, %v4668_v19  ;;  %v4698_v45 = vmax.f32 %v3681_v53, 0.0 }
 0x274   :  { %v914_v56 = vpop.f32.mrf.mxu1 }
 0x275   :  { %v560_v35 = vmax.f32 %v4079_v33, 0.0  ;;  %v1014_v12 = vadd.f32 %v914_v56, %v4697_v49  ;;  %2533 = vmatmul.msk.f32.gmra.mxu3 %vm566_vm1, %v1731_v63 }
 0x276   :  { %v1465_v10 = vpop.f32.mrf.mxu2 }
 0x277   :  { %v4089_v25 = vadd.f32 %v3870_v14, %v1014_v12  ;;  %v1599_v39 = vadd.f32 %v1465_v10, %v4698_v45  ;;  %2434 = vmatmul.msk.f32.gmra.mxu1 %vm566_vm1, %v560_v35 }
 0x278   :  { %v2020_v37 = vpop.f32.mrf.mxu3 }
 0x279   :  { %v2596_v19 = vpop.eup %2595  ;;  %v4670_v3 = vmax.f32 %v4089_v25, 0.0  ;;  %v1668_v1 = vadd.f32 %v3390_v28, %v1599_v39  ;;  %v2021_v56 = vadd.f32 %v3796_v58, %v2020_v37  ;;  %v4699_v28 = vmax.f32 %v3723_v27, 0.0  ;;  %v4124_v27 = vld [vmem:[%s4623_s4 + $0x1] ss:$0 sm:$0xff] }
 0x27a   :  { %2251 = vst [vmem:[%s4626_s7 + $0x58] sm:$0xff] %v2596_v19  ;;  %v495_v63 = vpop.f32.mrf.mxu0  ;;  %v4700_v37 = vmax.f32 %v3710_v62, 0.0 }
 0x27b   :  { %v1732_v49 = vmax.f32 %v1668_v1, 0.0  ;;  %2597 = vtanh.f32 %v2021_v56  ;;  %v4103_v53 = vadd.f32 %v3696_v61, %v495_v63  ;;  %2486 = vmatmul.msk.f32.gmra.mxu2 %vm566_vm1, %v4670_v3 }
 0x27c   :  { %v917_v12 = vpop.f32.mrf.mxu1 }
 0x27d   :  { %v4671_v10 = vmax.f32 %v4103_v53, 0.0  ;;  %v1015_v45 = vadd.f32 %v917_v12, %v4699_v28  ;;  %2534 = vmatmul.msk.f32.gmra.mxu3 %vm566_vm1, %v1732_v49 }
 0x27e   :  { %v1468_v39 = vpop.f32.mrf.mxu2 }
 0x27f   :  { %v4113_v19 = vadd.f32 %v3870_v14, %v1015_v45  ;;  %v1600_v61 = vadd.f32 %v1468_v39, %v4700_v37  ;;  %2435 = vmatmul.msk.f32.gmra.mxu1 %vm566_vm1, %v4671_v10  ;;  %v4701_v45 = vmax.f32 %v3744_v36, 0.0 }
 0x280   :  { %v2023_v1 = vpop.f32.mrf.mxu3 }
 0x281   :  { %v2598_v56 = vpop.eup %2597  ;;  %v4672_v63 = vmax.f32 %v4113_v19, 0.0  ;;  %v1669_v49 = vadd.f32 %v4124_v27, %v1600_v61  ;;  %v2024_v12 = vadd.f32 %v3796_v58, %v2023_v1  ;;  %v4702_v1 = vmax.f32 %v3734_v20, 0.0 }
 0x282   :  { %2252 = vst [vmem:[%s4626_s7 + $0x60] sm:$0xff] %v2598_v56 }
 0x283   :  { %v1733_v62 = vmax.f32 %v1669_v49, 0.0  ;;  %2599 = vtanh.f32 %v2024_v12  ;;  %2487 = vmatmul.msk.f32.gmra.mxu2 %vm566_vm1, %v4672_v63 }
 0x284   :  { %v920_v28 = vpop.f32.mrf.mxu1 }
 0x285   :  { %v1016_v39 = vadd.f32 %v920_v28, %v4701_v45  ;;  %2535 = vmatmul.msk.f32.gmra.mxu3 %vm566_vm1, %v1733_v62  ;;  %v4703_v45 = vmax.f32 %v3754_v11, 0.0 }
 0x286   :  { %v1471_v37 = vpop.f32.mrf.mxu2 }
 0x287   :  { %v4138_v61 = vadd.f32 %v3870_v14, %v1016_v39  ;;  %v1601_v3 = vadd.f32 %v1471_v37, %v4702_v1 }
 0x288   :  { %v2026_v56 = vpop.f32.mrf.mxu3 }
 0x289   :  { %v2600_v49 = vpop.eup %2599  ;;  %v1148_v12 = vmax.f32 %v4138_v61, 0.0  ;;  %v1670_v10 = vadd.f32 %v4124_v27, %v1601_v3  ;;  %v2027_v63 = vadd.f32 %v3796_v58, %v2026_v56 }
 0x28a   :  { %2253 = vst [vmem:[%s4626_s7 + $0x68] sm:$0xff] %v2600_v49 }
 0x28b   :  { %v1734_v36 = vmax.f32 %v1670_v10, 0.0  ;;  %2601 = vtanh.f32 %v2027_v63  ;;  %2488 = vmatmul.msk.f32.gmra.mxu2 %vm566_vm1, %v1148_v12 }
 0x28c   :  { %v923_v20 = vpop.f32.mrf.mxu1 }
 0x28d   :  { %v1017_v62 = vadd.f32 %v923_v20, %v547_v9  ;;  %2536 = vmatmul.msk.f32.gmra.mxu3 %vm566_vm1, %v1734_v36 }
 0x28e   :  { %v1474_v28 = vpop.f32.mrf.mxu2 }
 0x28f   :  { %v4155_v3 = vadd.f32 %v3870_v14, %v1017_v62  ;;  %v1602_v39 = vadd.f32 %v1474_v28, %v4703_v45 }
 0x290   :  { %v2029_v37 = vpop.f32.mrf.mxu3 }
 0x291   :  { %v2602_v10 = vpop.eup %2601  ;;  %v1149_v63 = vmax.f32 %v4155_v3, 0.0  ;;  %v1671_v1 = vadd.f32 %v4124_v27, %v1602_v39  ;;  %v2030_v56 = vadd.f32 %v3796_v58, %v2029_v37 }
 0x292   :  { %2254 = vst [vmem:[%s4626_s7 + $0x70] sm:$0xff] %v2602_v10 }
 0x293   :  { %v1735_v44 = vmax.f32 %v1671_v1, 0.0  ;;  %2603 = vtanh.f32 %v2030_v56  ;;  %2489 = vmatmul.msk.f32.gmra.mxu2 %vm566_vm1, %v1149_v63  ;;  %v4704_v1 = vmax.f32 %v3799_v0, 0.0 }
 0x294   :  { %v926_v11 = vpop.f32.mrf.mxu1 }
 0x295   :  { %v1018_v9 = vadd.f32 %v926_v11, %v548_v21  ;;  %2537 = vmatmul.msk.f32.gmra.mxu3 %vm566_vm1, %v1735_v44 }
 0x296   :  { %v1477_v49 = vpop.f32.mrf.mxu2 }
 0x297   :  { %v4172_v36 = vadd.f32 %v3870_v14, %v1018_v9  ;;  %v1603_v20 = vadd.f32 %v1477_v49, %v1133_v4 }
 0x298   :  { %v2032_v62 = vpop.f32.mrf.mxu3 }
 0x299   :  { %v2604_v28 = vpop.eup %2603  ;;  %v1150_v45 = vmax.f32 %v4172_v36, 0.0  ;;  %v1672_v39 = vadd.f32 %v4124_v27, %v1603_v20  ;;  %v2033_v37 = vadd.f32 %v3796_v58, %v2032_v62 }
 0x29a   :  { %2255 = vst [vmem:[%s4626_s7 + $0x78] sm:$0xff] %v2604_v28 }
 0x29b   :  { %v1736_v23 = vmax.f32 %v1672_v39, 0.0  ;;  %2605 = vtanh.f32 %v2033_v37  ;;  %2490 = vmatmul.msk.f32.gmra.mxu2 %vm566_vm1, %v1150_v45 }
 0x29c   :  { %v929_v2 = vpop.f32.mrf.mxu1 }
 0x29d   :  { %v1019_v4 = vadd.f32 %v929_v2, %v549_v55  ;;  %2538 = vmatmul.msk.f32.gmra.mxu3 %vm566_vm1, %v1736_v23 }
 0x29e   :  { %v1480_v21 = vpop.f32.mrf.mxu2 }
 0x29f   :  { %v4189_v10 = vadd.f32 %v3870_v14, %v1019_v4  ;;  %v1604_v56 = vadd.f32 %v1480_v21, %v4704_v1 }
 0x2a0   :  { %v2035_v44 = vpop.f32.mrf.mxu3 }
 0x2a1   :  { %v2606_v11 = vpop.eup %2605  ;;  %v1151_v9 = vmax.f32 %v4189_v10, 0.0  ;;  %v1673_v49 = vadd.f32 %v4124_v27, %v1604_v56  ;;  %v2036_v20 = vadd.f32 %v3796_v58, %v2035_v44 }
 0x2a2   :  { %2256 = vst [vmem:[%s4626_s7 + $0x80] sm:$0xff] %v2606_v11 }
 0x2a3   :  { %v1737_v5 = vmax.f32 %v1673_v49, 0.0  ;;  %2607 = vtanh.f32 %v2036_v20  ;;  %2491 = vmatmul.msk.f32.gmra.mxu2 %vm566_vm1, %v1151_v9 }
 0x2a4   :  { %v932_v0 = vpop.f32.mrf.mxu1 }
 0x2a5   :  { %v1020_v55 = vadd.f32 %v932_v0, %v550_v18  ;;  %2539 = vmatmul.msk.f32.gmra.mxu3 %vm566_vm1, %v1737_v5 }
 0x2a6   :  { %v1483_v62 = vpop.f32.mrf.mxu2 }
 0x2a7   :  { %v4206_v28 = vadd.f32 %v3870_v14, %v1020_v55  ;;  %v1605_v39 = vadd.f32 %v1483_v62, %v1135_v52 }
 0x2a8   :  { %v2038_v37 = vpop.f32.mrf.mxu3 }
 0x2a9   :  { %v2608_v23 = vpop.eup %2607  ;;  %v1152_v2 = vmax.f32 %v4206_v28, 0.0  ;;  %v1674_v4 = vadd.f32 %v4124_v27, %v1605_v39  ;;  %v2039_v21 = vadd.f32 %v3796_v58, %v2038_v37 }
 0x2aa   :  { %2257 = vst [vmem:[%s4626_s7 + $0x88] sm:$0xff] %v2608_v23 }
 0x2ab   :  { %v1738_v43 = vmax.f32 %v1674_v4, 0.0  ;;  %2609 = vtanh.f32 %v2039_v21  ;;  %2492 = vmatmul.msk.f32.gmra.mxu2 %vm566_vm1, %v1152_v2 }
 0x2ac   :  { %v935_v31 = vpop.f32.mrf.mxu1 }
 0x2ad   :  { %v1021_v52 = vadd.f32 %v935_v31, %v551_v26  ;;  %2540 = vmatmul.msk.f32.gmra.mxu3 %vm566_vm1, %v1738_v43 }
 0x2ae   :  { %v1486_v18 = vpop.f32.mrf.mxu2 }
 0x2af   :  { %v4223_v1 = vadd.f32 %v3870_v14, %v1021_v52  ;;  %v1606_v56 = vadd.f32 %v1486_v18, %v1136_v57 }
 0x2b0   :  { %v2041_v44 = vpop.f32.mrf.mxu3 }
 0x2b1   :  { %v2610_v11 = vpop.eup %2609  ;;  %v1153_v49 = vmax.f32 %v4223_v1, 0.0  ;;  %v1675_v20 = vadd.f32 %v4124_v27, %v1606_v56  ;;  %v2042_v5 = vadd.f32 %v3796_v58, %v2041_v44 }
 0x2b2   :  { %2258 = vst [vmem:[%s4626_s7 + $0x90] sm:$0xff] %v2610_v11 }
 0x2b3   :  { %v1739_v17 = vmax.f32 %v1675_v20, 0.0  ;;  %2611 = vtanh.f32 %v2042_v5  ;;  %2493 = vmatmul.msk.f32.gmra.mxu2 %vm566_vm1, %v1153_v49 }
 0x2b4   :  { %v938_v22 = vpop.f32.mrf.mxu1 }
 0x2b5   :  { %v1022_v57 = vadd.f32 %v938_v22, %v552_v6  ;;  %2541 = vmatmul.msk.f32.gmra.mxu3 %vm566_vm1, %v1739_v17 }
 0x2b6   :  { %v1489_v26 = vpop.f32.mrf.mxu2 }
 0x2b7   :  { %v4240_v0 = vadd.f32 %v3870_v14, %v1022_v57  ;;  %v1607_v55 = vadd.f32 %v1489_v26, %v1137_v59 }
 0x2b8   :  { %v2044_v62 = vpop.f32.mrf.mxu3 }
 0x2b9   :  { %v2612_v39 = vpop.eup %2611  ;;  %v1154_v37 = vmax.f32 %v4240_v0, 0.0  ;;  %v1676_v23 = vadd.f32 %v4124_v27, %v1607_v55  ;;  %v2045_v4 = vadd.f32 %v3796_v58, %v2044_v62 }
 0x2ba   :  { %2259 = vst [vmem:[%s4626_s7 + $0x98] sm:$0xff] %v2612_v39  ;;  %v4706_v39 = vmax.f32 %v3945_v15, 0.0 }
 0x2bb   :  { %v1740_v30 = vmax.f32 %v1676_v23, 0.0  ;;  %2613 = vtanh.f32 %v2045_v4  ;;  %2494 = vmatmul.msk.f32.gmra.mxu2 %vm566_vm1, %v1154_v37 }
 0x2bc   :  { %v941_v47 = vpop.f32.mrf.mxu1 }
 0x2bd   :  { %v1023_v59 = vadd.f32 %v941_v47, %v553_v40  ;;  %2542 = vmatmul.msk.f32.gmra.mxu3 %vm566_vm1, %v1740_v30 }
 0x2be   :  { %v1492_v6 = vpop.f32.mrf.mxu2 }
 0x2bf   :  { %v4257_v21 = vadd.f32 %v3870_v14, %v1023_v59  ;;  %v1608_v43 = vadd.f32 %v1492_v6, %v1138_v13 }
 0x2c0   :  { %v2047_v31 = vpop.f32.mrf.mxu3 }
 0x2c1   :  { %v2614_v52 = vpop.eup %2613  ;;  %v1155_v18 = vmax.f32 %v4257_v21, 0.0  ;;  %v1677_v56 = vadd.f32 %v4124_v27, %v1608_v43  ;;  %v2048_v44 = vadd.f32 %v3796_v58, %v2047_v31  ;;  %v4707_v43 = vmax.f32 %v3983_v46, 0.0 }
 0x2c2   :  { %2260 = vst [vmem:[%s4626_s7 + $0xa0] sm:$0xff] %v2614_v52 }
 0x2c3   :  { %v1741_v34 = vmax.f32 %v1677_v56, 0.0  ;;  %2615 = vtanh.f32 %v2048_v44  ;;  %2495 = vmatmul.msk.f32.gmra.mxu2 %vm566_vm1, %v1155_v18  ;;  %v4708_v44 = vmax.f32 %v3969_v32, 0.0 }
 0x2c4   :  { %v944_v7 = vpop.f32.mrf.mxu1 }
 0x2c5   :  { %v1024_v13 = vadd.f32 %v944_v7, %v554_v48  ;;  %2543 = vmatmul.msk.f32.gmra.mxu3 %vm566_vm1, %v1741_v34 }
 0x2c6   :  { %v1495_v40 = vpop.f32.mrf.mxu2 }
 0x2c7   :  { %v4274_v11 = vadd.f32 %v3870_v14, %v1024_v13  ;;  %v1609_v20 = vadd.f32 %v1495_v40, %v1139_v24  ;;  %v4705_v24 = vmax.f32 %v3959_v42, 0.0 }
 0x2c8   :  { %v2050_v5 = vpop.f32.mrf.mxu3 }
 0x2c9   :  { %v2616_v17 = vpop.eup %2615  ;;  %v1156_v22 = vmax.f32 %v4274_v11, 0.0  ;;  %v1678_v57 = vadd.f32 %v4124_v27, %v1609_v20  ;;  %v2051_v26 = vadd.f32 %v3796_v58, %v2050_v5 }
 0x2ca   :  { %2261 = vst [vmem:[%s4626_s7 + $0xa8] sm:$0xff] %v2616_v17  ;;  %v4709_v17 = vmax.f32 %v4007_v50, 0.0 }
 0x2cb   :  { %v1742_v38 = vmax.f32 %v1678_v57, 0.0  ;;  %2617 = vtanh.f32 %v2051_v26  ;;  %2496 = vmatmul.msk.f32.gmra.mxu2 %vm566_vm1, %v1156_v22 }
 0x2cc   :  { %v947_v60 = vpop.f32.mrf.mxu1 }
 0x2cd   :  { %v1025_v48 = vadd.f32 %v947_v60, %v4705_v24  ;;  %2544 = vmatmul.msk.f32.gmra.mxu3 %vm566_vm1, %v1742_v38  ;;  %v4710_v60 = vmax.f32 %v3993_v29, 0.0 }
 0x2ce   :  { %v1498_v55 = vpop.f32.mrf.mxu2 }
 0x2cf   :  { %v4291_v62 = vadd.f32 %v3870_v14, %v1025_v48  ;;  %v1610_v23 = vadd.f32 %v1498_v55, %v4706_v39 }
 0x2d0   :  { %v2053_v4 = vpop.f32.mrf.mxu3 }
 0x2d1   :  { %v2618_v30 = vpop.eup %2617  ;;  %v1157_v47 = vmax.f32 %v4291_v62, 0.0  ;;  %v1679_v59 = vadd.f32 %v4124_v27, %v1610_v23  ;;  %v2054_v6 = vadd.f32 %v3796_v58, %v2053_v4 }
 0x2d2   :  { %2262 = vst [vmem:[%s4626_s7 + $0xb0] sm:$0xff] %v2618_v30  ;;  %v4711_v30 = vmax.f32 %v4031_v54, 0.0 }
 0x2d3   :  { %v1743_v42 = vmax.f32 %v1679_v59, 0.0  ;;  %2619 = vtanh.f32 %v2054_v6  ;;  %2497 = vmatmul.msk.f32.gmra.mxu2 %vm566_vm1, %v1157_v47 }
 0x2d4   :  { %v950_v15 = vpop.f32.mrf.mxu1 }
 0x2d5   :  { %v1026_v31 = vadd.f32 %v950_v15, %v4707_v43  ;;  %2545 = vmatmul.msk.f32.gmra.mxu3 %vm566_vm1, %v1743_v42  ;;  %v4712_v15 = vmax.f32 %v4017_v51, 0.0 }
 0x2d6   :  { %v1501_v52 = vpop.f32.mrf.mxu2 }
 0x2d7   :  { %v4308_v56 = vadd.f32 %v3870_v14, %v1026_v31  ;;  %v1611_v34 = vadd.f32 %v1501_v52, %v4708_v44 }
 0x2d8   :  { %v2056_v7 = vpop.f32.mrf.mxu3 }
 0x2d9   :  { %v2620_v13 = vpop.eup %2619  ;;  %v1158_v40 = vmax.f32 %v4308_v56, 0.0  ;;  %v1680_v20 = vadd.f32 %v4124_v27, %v1611_v34  ;;  %v2057_v5 = vadd.f32 %v3796_v58, %v2056_v7 }
 0x2da   :  { %2263 = vst [vmem:[%s4626_s7 + $0xb8] sm:$0xff] %v2620_v13  ;;  %v4713_v13 = vmax.f32 %v4055_v41, 0.0 }
 0x2db   :  { %v1744_v46 = vmax.f32 %v1680_v20, 0.0  ;;  %2621 = vtanh.f32 %v2057_v5  ;;  %2498 = vmatmul.msk.f32.gmra.mxu2 %vm566_vm1, %v1158_v40 }
 0x2dc   :  { %v953_v32 = vpop.f32.mrf.mxu1 }
 0x2dd   :  { %v1027_v57 = vadd.f32 %v953_v32, %v4709_v17  ;;  %2546 = vmatmul.msk.f32.gmra.mxu3 %vm566_vm1, %v1744_v46  ;;  %v4714_v32 = vmax.f32 %v4041_v8, 0.0 }
 0x2de   :  { %v1504_v26 = vpop.f32.mrf.mxu2 }
 0x2df   :  { %v4325_v38 = vadd.f32 %v3870_v14, %v1027_v57  ;;  %v1612_v24 = vadd.f32 %v1504_v26, %v4710_v60 }
 0x2e0   :  { %v2059_v48 = vpop.f32.mrf.mxu3 }
 0x2e1   :  { %v2622_v55 = vpop.eup %2621  ;;  %v1159_v39 = vmax.f32 %v4325_v38, 0.0  ;;  %v1681_v23 = vadd.f32 %v4124_v27, %v1612_v24  ;;  %v2060_v4 = vadd.f32 %v3796_v58, %v2059_v48 }
 0x2e2   :  { %2264 = vst [vmem:[%s4626_s7 + $0xc0] sm:$0xff] %v2622_v55 }
 0x2e3   :  { %v1745_v50 = vmax.f32 %v1681_v23, 0.0  ;;  %2623 = vtanh.f32 %v2060_v4  ;;  %2499 = vmatmul.msk.f32.gmra.mxu2 %vm566_vm1, %v1159_v39 }
 0x2e4   :  { %v956_v29 = vpop.f32.mrf.mxu1 }
 0x2e5   :  { %v1028_v59 = vadd.f32 %v956_v29, %v4711_v30  ;;  %2547 = vmatmul.msk.f32.gmra.mxu3 %vm566_vm1, %v1745_v50  ;;  %v4715_v50 = vmax.f32 %v4065_v16, 0.0 }
 0x2e6   :  { %v1507_v6 = vpop.f32.mrf.mxu2 }
 0x2e7   :  { %v4342_v42 = vadd.f32 %v3870_v14, %v1028_v59  ;;  %v1613_v43 = vadd.f32 %v1507_v6, %v4712_v15 }
 0x2e8   :  { %v2062_v31 = vpop.f32.mrf.mxu3 }
 0x2e9   :  { %v2624_v52 = vpop.eup %2623  ;;  %v1160_v44 = vmax.f32 %v4342_v42, 0.0  ;;  %v1682_v34 = vadd.f32 %v4124_v27, %v1613_v43  ;;  %v2063_v7 = vadd.f32 %v3796_v58, %v2062_v31 }
 0x2ea   :  { %2265 = vst [vmem:[%s4626_s7 + $0xc8] sm:$0xff] %v2624_v52 }
 0x2eb   :  { %v1746_v54 = vmax.f32 %v1682_v34, 0.0  ;;  %2625 = vtanh.f32 %v2063_v7  ;;  %2500 = vmatmul.msk.f32.gmra.mxu2 %vm566_vm1, %v1160_v44  ;;  %v4717_v7 = vmax.f32 %v4089_v25, 0.0  ;;  %v4718_v25 = vmax.f32 %v4113_v19, 0.0 }
 0x2ec   :  { %v959_v51 = vpop.f32.mrf.mxu1 }
 0x2ed   :  { %v1029_v20 = vadd.f32 %v959_v51, %v4713_v13  ;;  %2548 = vmatmul.msk.f32.gmra.mxu3 %vm566_vm1, %v1746_v54 }
 0x2ee   :  { %v1510_v5 = vpop.f32.mrf.mxu2 }
 0x2ef   :  { %v4359_v46 = vadd.f32 %v3870_v14, %v1029_v20  ;;  %v1614_v17 = vadd.f32 %v1510_v5, %v4714_v32 }
 0x2f0   :  { %v2065_v57 = vpop.f32.mrf.mxu3 }
 0x2f1   :  { %v2626_v26 = vpop.eup %2625  ;;  %v1161_v60 = vmax.f32 %v4359_v46, 0.0  ;;  %v1683_v24 = vadd.f32 %v4124_v27, %v1614_v17  ;;  %v2066_v48 = vadd.f32 %v3796_v58, %v2065_v57 }
 0x2f2   :  { %2266 = vst [vmem:[%s4626_s7 + $0xd0] sm:$0xff] %v2626_v26 }
 0x2f3   :  { %v1747_v41 = vmax.f32 %v1683_v24, 0.0  ;;  %2627 = vtanh.f32 %v2066_v48  ;;  %2501 = vmatmul.msk.f32.gmra.mxu2 %vm566_vm1, %v1161_v60 }
 0x2f4   :  { %v962_v8 = vpop.f32.mrf.mxu1 }
 0x2f5   :  { %v1030_v55 = vadd.f32 %v962_v8, %v560_v35  ;;  %2549 = vmatmul.msk.f32.gmra.mxu3 %vm566_vm1, %v1747_v41  ;;  %v4716_v35 = vmax.f32 %v4103_v53, 0.0 }
 0x2f6   :  { %v1513_v23 = vpop.f32.mrf.mxu2 }
 0x2f7   :  { %v4376_v4 = vadd.f32 %v3870_v14, %v1030_v55  ;;  %v1615_v29 = vadd.f32 %v1513_v23, %v4715_v50 }
 0x2f8   :  { %v2068_v30 = vpop.f32.mrf.mxu3 }
 0x2f9   :  { %v2628_v59 = vpop.eup %2627  ;;  %v1162_v6 = vmax.f32 %v4376_v4, 0.0  ;;  %v1684_v15 = vadd.f32 %v4124_v27, %v1615_v29  ;;  %v2069_v43 = vadd.f32 %v3796_v58, %v2068_v30 }
 0x2fa   :  { %2267 = vst [vmem:[%s4626_s7 + $0xd8] sm:$0xff] %v2628_v59 }
 0x2fb   :  { %v1748_v33 = vmax.f32 %v1684_v15, 0.0  ;;  %2629 = vtanh.f32 %v2069_v43  ;;  %2502 = vmatmul.msk.f32.gmra.mxu2 %vm566_vm1, %v1162_v6 }
 0x2fc   :  { %v965_v16 = vpop.f32.mrf.mxu1 }
 0x2fd   :  { %v1031_v31 = vadd.f32 %v965_v16, %v4716_v35  ;;  %2550 = vmatmul.msk.f32.gmra.mxu3 %vm566_vm1, %v1748_v33 }
 0x2fe   :  { %v1516_v52 = vpop.f32.mrf.mxu2 }
 0x2ff   :  { %v4393_v34 = vadd.f32 %v3870_v14, %v1031_v31  ;;  %v1616_v54 = vadd.f32 %v1516_v52, %v4717_v7 }
 0x300   :  { %v2071_v51 = vpop.f32.mrf.mxu3 }
 0x301   :  { %v2630_v13 = vpop.eup %2629  ;;  %v1163_v20 = vmax.f32 %v4393_v34, 0.0  ;;  %v1685_v5 = vadd.f32 %v4124_v27, %v1616_v54  ;;  %v2072_v32 = vadd.f32 %v3796_v58, %v2071_v51 }
 0x302   :  { %2268 = vst [vmem:[%s4626_s7 + $0xe0] sm:$0xff] %v2630_v13 }
 0x303   :  { %v1749_v53 = vmax.f32 %v1685_v5, 0.0  ;;  %2631 = vtanh.f32 %v2072_v32  ;;  %2503 = vmatmul.msk.f32.gmra.mxu2 %vm566_vm1, %v1163_v20 }
 0x305   :  { %2551 = vmatmul.msk.f32.gmra.mxu3 %vm566_vm1, %v1749_v53 }
 0x306   :  { %v1519_v14 = vpop.f32.mrf.mxu2 }
 0x307   :  { %v1617_v17 = vadd.f32 %v1519_v14, %v4718_v25 }
 0x308   :  { %v2074_v57 = vpop.f32.mrf.mxu3 }
 0x309   :  { %v2632_v26 = vpop.eup %2631  ;;  %v1686_v24 = vadd.f32 %v4124_v27, %v1617_v17  ;;  %v2075_v48 = vadd.f32 %v3796_v58, %v2074_v57  ;;  %v4421_v58 = vld [vmem:[%s4625_s6] ss:$0 sm:$0xff] }
 0x30a   :  { %2269 = vst [vmem:[%s4626_s7 + $0xe8] sm:$0xff] %v2632_v26 }
 0x30b   :  { %v1750_v41 = vmax.f32 %v1686_v24, 0.0  ;;  %2633 = vtanh.f32 %v2075_v48 }
 0x30d   :  { %2552 = vmatmul.msk.f32.gmra.mxu3 %vm566_vm1, %v1750_v41 }
 0x30e   :  { %v1522_v8 = vpop.f32.mrf.mxu2 }
 0x30f   :  { %v1618_v55 = vadd.f32 %v1522_v8, %v1148_v12 }
 0x310   :  { %v2077_v19 = vpop.f32.mrf.mxu3 }
 0x311   :  { %v2634_v23 = vpop.eup %2633  ;;  %v1687_v50 = vadd.f32 %v4124_v27, %v1618_v55  ;;  %v2078_v29 = vadd.f32 %v4421_v58, %v2077_v19 }
 0x312   :  { %2270 = vst [vmem:[%s4626_s7 + $0xf0] sm:$0xff] %v2634_v23 }
 0x313   :  { %v1751_v30 = vmax.f32 %v1687_v50, 0.0  ;;  %2635 = vtanh.f32 %v2078_v29 }
 0x315   :  { %2553 = vmatmul.msk.f32.gmra.mxu3 %vm566_vm1, %v1751_v30 }
 0x316   :  { %v1525_v61 = vpop.f32.mrf.mxu2 }
 0x317   :  { %v1619_v12 = vadd.f32 %v1525_v61, %v1149_v63 }
 0x318   :  { %v2080_v59 = vpop.f32.mrf.mxu3 }
 0x319   :  { %v2636_v15 = vpop.eup %2635  ;;  %v1688_v43 = vadd.f32 %v4124_v27, %v1619_v12  ;;  %v2081_v33 = vadd.f32 %v4421_v58, %v2080_v59 }
 0x31a   :  { %2271 = vst [vmem:[%s4626_s7 + $0xf8] sm:$0xff] %v2636_v15 }
 0x31b   :  { %v1752_v16 = vmax.f32 %v1688_v43, 0.0  ;;  %2637 = vtanh.f32 %v2081_v33 }
 0x31d   :  { %2554 = vmatmul.msk.f32.gmra.mxu3 %vm566_vm1, %v1752_v16 }
 0x31e   :  { %v1528_v35 = vpop.f32.mrf.mxu2 }
 0x31f   :  { %v1620_v31 = vadd.f32 %v1528_v35, %v1150_v45 }
 0x320   :  { %v2083_v3 = vpop.f32.mrf.mxu3 }
 0x321   :  { %v2638_v63 = vpop.eup %2637  ;;  %v1689_v52 = vadd.f32 %v4124_v27, %v1620_v31  ;;  %v2084_v7 = vadd.f32 %v4421_v58, %v2083_v3 }
 0x322   :  { %2272 = vst [vmem:[%s4626_s7 + $0x100] sm:$0xff] %v2638_v63 }
 0x323   :  { %v1753_v54 = vmax.f32 %v1689_v52, 0.0  ;;  %2639 = vtanh.f32 %v2084_v7 }
 0x325   :  { %2555 = vmatmul.msk.f32.gmra.mxu3 %vm566_vm1, %v1753_v54 }
 0x326   :  { %v1531_v51 = vpop.f32.mrf.mxu2 }
 0x327   :  { %v1621_v13 = vadd.f32 %v1531_v51, %v1151_v9 }
 0x328   :  { %v2086_v36 = vpop.f32.mrf.mxu3 }
 0x329   :  { %v2640_v45 = vpop.eup %2639  ;;  %v1690_v5 = vadd.f32 %v4124_v27, %v1621_v13  ;;  %v2087_v32 = vadd.f32 %v4421_v58, %v2086_v36 }
 0x32a   :  { %2273 = vst [vmem:[%s4626_s7 + $0x108] sm:$0xff] %v2640_v45 }
 0x32b   :  { %v1754_v53 = vmax.f32 %v1690_v5, 0.0  ;;  %2641 = vtanh.f32 %v2087_v32 }
 0x32d   :  { %2556 = vmatmul.msk.f32.gmra.mxu3 %vm566_vm1, %v1754_v53 }
 0x32e   :  { %v1534_v14 = vpop.f32.mrf.mxu2 }
 0x32f   :  { %v1622_v25 = vadd.f32 %v1534_v14, %v1152_v2 }
 0x330   :  { %v2089_v10 = vpop.f32.mrf.mxu3 }
 0x331   :  { %v2642_v9 = vpop.eup %2641  ;;  %v1691_v17 = vadd.f32 %v4124_v27, %v1622_v25  ;;  %v2090_v57 = vadd.f32 %v4421_v58, %v2089_v10 }
 0x332   :  { %2274 = vst [vmem:[%s4626_s7 + $0x110] sm:$0xff] %v2642_v9 }
 0x333   :  { %v1755_v26 = vmax.f32 %v1691_v17, 0.0  ;;  %2643 = vtanh.f32 %v2090_v57 }
 0x335   :  { %2557 = vmatmul.msk.f32.gmra.mxu3 %vm566_vm1, %v1755_v26 }
 0x336   :  { %v1537_v24 = vpop.f32.mrf.mxu2 }
 0x337   :  { %v1623_v48 = vadd.f32 %v1537_v24, %v1153_v49 }
 0x338   :  { %v2092_v28 = vpop.f32.mrf.mxu3 }
 0x339   :  { %v2644_v2 = vpop.eup %2643  ;;  %v1692_v41 = vadd.f32 %v4124_v27, %v1623_v48  ;;  %v2093_v8 = vadd.f32 %v4421_v58, %v2092_v28 }
 0x33a   :  { %2275 = vst [vmem:[%s4626_s7 + $0x118] sm:$0xff] %v2644_v2 }
 0x33b   :  { %v1756_v55 = vmax.f32 %v1692_v41, 0.0  ;;  %2645 = vtanh.f32 %v2093_v8 }
 0x33d   :  { %2558 = vmatmul.msk.f32.gmra.mxu3 %vm566_vm1, %v1756_v55 }
 0x33e   :  { %v1540_v19 = vpop.f32.mrf.mxu2 }
 0x33f   :  { %v1624_v23 = vadd.f32 %v1540_v19, %v1154_v37 }
 0x340   :  { %v2095_v1 = vpop.f32.mrf.mxu3 }
 0x341   :  { %v2646_v49 = vpop.eup %2645  ;;  %v1693_v50 = vadd.f32 %v4124_v27, %v1624_v23  ;;  %v2096_v29 = vadd.f32 %v4421_v58, %v2095_v1 }
 0x342   :  { %2276 = vst [vmem:[%s4626_s7 + $0x120] sm:$0xff] %v2646_v49 }
 0x343   :  { %v1757_v30 = vmax.f32 %v1693_v50, 0.0  ;;  %2647 = vtanh.f32 %v2096_v29 }
 0x345   :  { %2559 = vmatmul.msk.f32.gmra.mxu3 %vm566_vm1, %v1757_v30 }
 0x346   :  { %v1543_v61 = vpop.f32.mrf.mxu2 }
 0x347   :  { %v1625_v12 = vadd.f32 %v1543_v61, %v1155_v18 }
 0x348   :  { %v2098_v0 = vpop.f32.mrf.mxu3 }
 0x349   :  { %v2648_v37 = vpop.eup %2647  ;;  %v1694_v59 = vadd.f32 %v4124_v27, %v1625_v12  ;;  %v2099_v15 = vadd.f32 %v4421_v58, %v2098_v0 }
 0x34a   :  { %2277 = vst [vmem:[%s4626_s7 + $0x128] sm:$0xff] %v2648_v37 }
 0x34b   :  { %v1758_v43 = vmax.f32 %v1694_v59, 0.0  ;;  %2649 = vtanh.f32 %v2099_v15 }
 0x34d   :  { %2560 = vmatmul.msk.f32.gmra.mxu3 %vm566_vm1, %v1758_v43 }
 0x34e   :  { %v1546_v33 = vpop.f32.mrf.mxu2 }
 0x34f   :  { %v1626_v16 = vadd.f32 %v1546_v33, %v1156_v22 }
 0x350   :  { %v2101_v21 = vpop.f32.mrf.mxu3 }
 0x351   :  { %v2650_v18 = vpop.eup %2649  ;;  %v1695_v35 = vadd.f32 %v4124_v27, %v1626_v16  ;;  %v2102_v31 = vadd.f32 %v4421_v58, %v2101_v21 }
 0x352   :  { %2278 = vst [vmem:[%s4626_s7 + $0x130] sm:$0xff] %v2650_v18 }
 0x353   :  { %v1759_v3 = vmax.f32 %v1695_v35, 0.0  ;;  %2651 = vtanh.f32 %v2102_v31 }
 0x355   :  { %2561 = vmatmul.msk.f32.gmra.mxu3 %vm566_vm1, %v1759_v3 }
 0x356   :  { %v1549_v63 = vpop.f32.mrf.mxu2 }
 0x357   :  { %v1627_v52 = vadd.f32 %v1549_v63, %v1157_v47 }
 0x358   :  { %v2104_v11 = vpop.f32.mrf.mxu3 }
 0x359   :  { %v2652_v22 = vpop.eup %2651  ;;  %v1696_v7 = vadd.f32 %v4124_v27, %v1627_v52  ;;  %v2105_v54 = vadd.f32 %v4421_v58, %v2104_v11 }
 0x35a   :  { %2279 = vst [vmem:[%s4626_s7 + $0x138] sm:$0xff] %v2652_v22 }
 0x35b   :  { %v1760_v51 = vmax.f32 %v1696_v7, 0.0  ;;  %2653 = vtanh.f32 %v2105_v54 }
 0x35d   :  { %2562 = vmatmul.msk.f32.gmra.mxu3 %vm566_vm1, %v1760_v51 }
 0x35e   :  { %v1552_v13 = vpop.f32.mrf.mxu2 }
 0x35f   :  { %v1628_v36 = vadd.f32 %v1552_v13, %v1158_v40 }
 0x360   :  { %v2107_v62 = vpop.f32.mrf.mxu3 }
 0x361   :  { %v2654_v47 = vpop.eup %2653  ;;  %v1697_v45 = vadd.f32 %v4124_v27, %v1628_v36  ;;  %v2108_v5 = vadd.f32 %v4421_v58, %v2107_v62 }
 0x362   :  { %2280 = vst [vmem:[%s4626_s7 + $0x140] sm:$0xff] %v2654_v47 }
 0x363   :  { %v1761_v32 = vmax.f32 %v1697_v45, 0.0  ;;  %2655 = vtanh.f32 %v2108_v5 }
 0x365   :  { %2563 = vmatmul.msk.f32.gmra.mxu3 %vm566_vm1, %v1761_v32 }
 0x366   :  { %v1555_v53 = vpop.f32.mrf.mxu2 }
 0x367   :  { %v1629_v14 = vadd.f32 %v1555_v53, %v1159_v39 }
 0x368   :  { %v2110_v56 = vpop.f32.mrf.mxu3 }
 0x369   :  { %v2656_v40 = vpop.eup %2655  ;;  %v1698_v25 = vadd.f32 %v4124_v27, %v1629_v14  ;;  %v2111_v10 = vadd.f32 %v4421_v58, %v2110_v56 }
 0x36a   :  { %2281 = vst [vmem:[%s4626_s7 + $0x148] sm:$0xff] %v2656_v40 }
 0x36b   :  { %v1762_v9 = vmax.f32 %v1698_v25, 0.0  ;;  %2657 = vtanh.f32 %v2111_v10 }
 0x36d   :  { %2564 = vmatmul.msk.f32.gmra.mxu3 %vm566_vm1, %v1762_v9 }
 0x36e   :  { %v1558_v17 = vpop.f32.mrf.mxu2 }
 0x36f   :  { %v1630_v57 = vadd.f32 %v1558_v17, %v1160_v44 }
 0x370   :  { %v2113_v38 = vpop.f32.mrf.mxu3 }
 0x371   :  { %v2658_v39 = vpop.eup %2657  ;;  %v1699_v26 = vadd.f32 %v4124_v27, %v1630_v57  ;;  %v2114_v24 = vadd.f32 %v4421_v58, %v2113_v38 }
 0x372   :  { %2282 = vst [vmem:[%s4626_s7 + $0x150] sm:$0xff] %v2658_v39 }
 0x373   :  { %v1763_v48 = vmax.f32 %v1699_v26, 0.0  ;;  %2659 = vtanh.f32 %v2114_v24 }
 0x375   :  { %2565 = vmatmul.msk.f32.gmra.mxu3 %vm566_vm1, %v1763_v48 }
 0x376   :  { %v1561_v28 = vpop.f32.mrf.mxu2 }
 0x377   :  { %v1631_v2 = vadd.f32 %v1561_v28, %v1161_v60 }
 0x378   :  { %v2116_v42 = vpop.f32.mrf.mxu3 }
 0x379   :  { %v2660_v44 = vpop.eup %2659  ;;  %v1700_v41 = vadd.f32 %v4124_v27, %v1631_v2  ;;  %v2117_v8 = vadd.f32 %v4421_v58, %v2116_v42 }
 0x37a   :  { %2283 = vst [vmem:[%s4626_s7 + $0x158] sm:$0xff] %v2660_v44 }
 0x37b   :  { %v1764_v55 = vmax.f32 %v1700_v41, 0.0  ;;  %2661 = vtanh.f32 %v2117_v8 }
 0x37d   :  { %2566 = vmatmul.msk.f32.gmra.mxu3 %vm566_vm1, %v1764_v55 }
 0x37e   :  { %v1564_v19 = vpop.f32.mrf.mxu2 }
 0x37f   :  { %v1632_v23 = vadd.f32 %v1564_v19, %v1162_v6 }
 0x380   :  { %v2119_v46 = vpop.f32.mrf.mxu3 }
 0x381   :  { %v2662_v60 = vpop.eup %2661  ;;  %v1701_v1 = vadd.f32 %v4124_v27, %v1632_v23  ;;  %v2120_v49 = vadd.f32 %v4421_v58, %v2119_v46 }
 0x382   :  { %2284 = vst [vmem:[%s4626_s7 + $0x160] sm:$0xff] %v2662_v60 }
 0x383   :  { %v1765_v50 = vmax.f32 %v1701_v1, 0.0  ;;  %2663 = vtanh.f32 %v2120_v49 }
 0x385   :  { %2567 = vmatmul.msk.f32.gmra.mxu3 %vm566_vm1, %v1765_v50 }
 0x386   :  { %v1567_v29 = vpop.f32.mrf.mxu2 }
 0x387   :  { %v1633_v30 = vadd.f32 %v1567_v29, %v1163_v20 }
 0x388   :  { %v2122_v4 = vpop.f32.mrf.mxu3 }
 0x389   :  { %v2664_v6 = vpop.eup %2663  ;;  %v1702_v61 = vadd.f32 %v4124_v27, %v1633_v30  ;;  %v2123_v12 = vadd.f32 %v4421_v58, %v2122_v4 }
 0x38a   :  { %2285 = vst [vmem:[%s4626_s7 + $0x168] sm:$0xff] %v2664_v6 }
 0x38b   :  { %v1766_v0 = vmax.f32 %v1702_v61, 0.0  ;;  %2665 = vtanh.f32 %v2123_v12 }
 0x38d   :  { %2568 = vmatmul.msk.f32.gmra.mxu3 %vm566_vm1, %v1766_v0 }
 0x390   :  { %v2125_v37 = vpop.f32.mrf.mxu3 }
 0x391   :  { %v2666_v59 = vpop.eup %2665  ;;  %v2126_v15 = vadd.f32 %v4421_v58, %v2125_v37 }
 0x392   :  { %2286 = vst [vmem:[%s4626_s7 + $0x170] sm:$0xff] %v2666_v59 }
 0x393   :  { %2667 = vtanh.f32 %v2126_v15 }
 0x398   :  { %v2128_v27 = vpop.f32.mrf.mxu3 }
 0x399   :  { %v2668_v34 = vpop.eup %2667  ;;  %v2129_v20 = vadd.f32 %v4421_v58, %v2128_v27 }
 0x39a   :  { %2287 = vst [vmem:[%s4626_s7 + $0x178] sm:$0xff] %v2668_v34 }
 0x39b   :  { %2669 = vtanh.f32 %v2129_v20 }
 0x3a0   :  { %v2131_v43 = vpop.f32.mrf.mxu3 }
 0x3a1   :  { %v2670_v33 = vpop.eup %2669  ;;  %v2132_v16 = vadd.f32 %v4421_v58, %v2131_v43 }
 0x3a2   :  { %2288 = vst [vmem:[%s4626_s7 + $0x180] sm:$0xff] %v2670_v33 }
 0x3a3   :  { %2671 = vtanh.f32 %v2132_v16 }
 0x3a8   :  { %v2134_v21 = vpop.f32.mrf.mxu3 }
 0x3a9   :  { %v2672_v18 = vpop.eup %2671  ;;  %v2135_v35 = vadd.f32 %v4421_v58, %v2134_v21 }
 0x3aa   :  { %2289 = vst [vmem:[%s4626_s7 + $0x188] sm:$0xff] %v2672_v18 }
 0x3ab   :  { %2673 = vtanh.f32 %v2135_v35 }
 0x3b0   :  { %v2137_v31 = vpop.f32.mrf.mxu3 }
 0x3b1   :  { %v2674_v3 = vpop.eup %2673  ;;  %v2138_v63 = vadd.f32 %v4421_v58, %v2137_v31 }
 0x3b2   :  { %2290 = vst [vmem:[%s4626_s7 + $0x190] sm:$0xff] %v2674_v3 }
 0x3b3   :  { %2675 = vtanh.f32 %v2138_v63 }
 0x3b8   :  { %v2140_v52 = vpop.f32.mrf.mxu3 }
 0x3b9   :  { %v2676_v11 = vpop.eup %2675  ;;  %v2141_v22 = vadd.f32 %v4421_v58, %v2140_v52 }
 0x3ba   :  { %2291 = vst [vmem:[%s4626_s7 + $0x198] sm:$0xff] %v2676_v11 }
 0x3bb   :  { %2677 = vtanh.f32 %v2141_v22 }
 0x3c0   :  { %v2143_v7 = vpop.f32.mrf.mxu3 }
 0x3c1   :  { %v2678_v54 = vpop.eup %2677  ;;  %v2144_v51 = vadd.f32 %v4421_v58, %v2143_v7 }
 0x3c2   :  { %2292 = vst [vmem:[%s4626_s7 + $0x1a0] sm:$0xff] %v2678_v54 }
 0x3c3   :  { %2679 = vtanh.f32 %v2144_v51 }
 0x3c8   :  { %v2146_v13 = vpop.f32.mrf.mxu3 }
 0x3c9   :  { %v2680_v36 = vpop.eup %2679  ;;  %v2147_v62 = vadd.f32 %v4421_v58, %v2146_v13 }
 0x3ca   :  { %2293 = vst [vmem:[%s4626_s7 + $0x1a8] sm:$0xff] %v2680_v36 }
 0x3cb   :  { %2681 = vtanh.f32 %v2147_v62 }
 0x3d0   :  { %v2149_v47 = vpop.f32.mrf.mxu3 }
 0x3d1   :  { %v2682_v45 = vpop.eup %2681  ;;  %v2150_v5 = vadd.f32 %v4421_v58, %v2149_v47 }
 0x3d2   :  { %2294 = vst [vmem:[%s4626_s7 + $0x1b0] sm:$0xff] %v2682_v45 }
 0x3d3   :  { %2683 = vtanh.f32 %v2150_v5 }
 0x3d8   :  { %v2152_v32 = vpop.f32.mrf.mxu3 }
 0x3d9   :  { %v2684_v53 = vpop.eup %2683  ;;  %v2153_v14 = vadd.f32 %v4421_v58, %v2152_v32 }
 0x3da   :  { %2295 = vst [vmem:[%s4626_s7 + $0x1b8] sm:$0xff] %v2684_v53 }
 0x3db   :  { %2685 = vtanh.f32 %v2153_v14 }
 0x3e0   :  { %v2155_v56 = vpop.f32.mrf.mxu3 }
 0x3e1   :  { %v2686_v40 = vpop.eup %2685  ;;  %v2156_v25 = vadd.f32 %v4421_v58, %v2155_v56 }
 0x3e2   :  { %2296 = vst [vmem:[%s4626_s7 + $0x1c0] sm:$0xff] %v2686_v40 }
 0x3e3   :  { %2687 = vtanh.f32 %v2156_v25 }
 0x3e8   :  { %v2158_v10 = vpop.f32.mrf.mxu3 }
 0x3e9   :  { %v2688_v9 = vpop.eup %2687  ;;  %v2159_v17 = vadd.f32 %v4421_v58, %v2158_v10 }
 0x3ea   :  { %2297 = vst [vmem:[%s4626_s7 + $0x1c8] sm:$0xff] %v2688_v9 }
 0x3eb   :  { %2689 = vtanh.f32 %v2159_v17 }
 0x3f0   :  { %v2161_v57 = vpop.f32.mrf.mxu3 }
 0x3f1   :  { %v2690_v38 = vpop.eup %2689  ;;  %v2162_v39 = vadd.f32 %v4421_v58, %v2161_v57 }
 0x3f2   :  { %2298 = vst [vmem:[%s4626_s7 + $0x1d0] sm:$0xff] %v2690_v38 }
 0x3f3   :  { %2691 = vtanh.f32 %v2162_v39 }
 0x3f8   :  { %v2164_v26 = vpop.f32.mrf.mxu3 }
 0x3f9   :  { %v2692_v24 = vpop.eup %2691  ;;  %v2165_v48 = vadd.f32 %v4421_v58, %v2164_v26 }
 0x3fa   :  { %2299 = vst [vmem:[%s4626_s7 + $0x1d8] sm:$0xff] %v2692_v24 }
 0x3fb   :  { %2693 = vtanh.f32 %v2165_v48 }
 0x400   :  { %v2167_v28 = vpop.f32.mrf.mxu3 }
 0x401   :  { %v2694_v2 = vpop.eup %2693  ;;  %v2168_v42 = vadd.f32 %v4421_v58, %v2167_v28 }
 0x402   :  { %2300 = vst [vmem:[%s4626_s7 + $0x1e0] sm:$0xff] %v2694_v2 }
 0x403   :  { %2695 = vtanh.f32 %v2168_v42 }
 0x408   :  { %v2170_v44 = vpop.f32.mrf.mxu3 }
 0x409   :  { %v2696_v41 = vpop.eup %2695  ;;  %v2171_v8 = vadd.f32 %v4421_v58, %v2170_v44 }
 0x40a   :  { %2301 = vst [vmem:[%s4626_s7 + $0x1e8] sm:$0xff] %v2696_v41 }
 0x40b   :  { %2697 = vtanh.f32 %v2171_v8 }
 0x410   :  { %v2173_v55 = vpop.f32.mrf.mxu3 }
 0x411   :  { %v2698_v19 = vpop.eup %2697  ;;  %v2174_v23 = vadd.f32 %v4421_v58, %v2173_v55 }
 0x412   :  { %2302 = vst [vmem:[%s4626_s7 + $0x1f0] sm:$0xff] %v2698_v19 }
 0x413   :  { %2699 = vtanh.f32 %v2174_v23 }
 0x419   :  { %v2700_v46 = vpop.eup %2699 }
 0x41a   :  { %2303 = vst [vmem:[%s4626_s7 + $0x1f8] sm:$0xff] %v2700_v46 }

</bundles_post_ra>
